<compile_context>
chip_gen: v7x
topology: tpu7x:2x2x1
jax: 0.10.0
libtpu: 0.0.40
codegen_flags: <defaults>
</compile_context>

<pallas_src>
import numpy as np
import jax
import jax.numpy as jnp
from jax.experimental import pallas as pl
from jax.experimental.pallas import tpu as pltpu

LANE = 128


# ------------------------------- fused kernel --------------------------------

def _fused_net_kernel(x4_ref, a1_ref, b1_ref, a2_ref, b2_ref,
                      fw1_ref, fb1_ref, fw2_ref, fb2_ref, fw3_ref, fb3_ref,
                      o_ref):
    """Whole forward pass for ONE sample; all intermediates stay on-chip.

    x4_ref : [1, 4, 8, 128] bf16  image rows split by (row mod 4); lane = w*3 + ci
    a1_ref : [5, 128, 256]  bf16  conv1 row-conv matrices per kh; col = dx*128 + j*6 + co
    b1_ref : [1, 128] f32         conv1 bias tiled over the 14 pooled columns
    a2_ref : [5, 128, 256]  bf16  conv2 row-conv matrices per kh; col = dx*128 + u*16 + co
    b2_ref : [1, 128] f32         conv2 bias tiled over the 5 pooled columns
    fw1_ref: [5, 128, 128]  bf16  fc1 weights split/permuted by pooled2 row i2
    fw2/fw3: [128, 128]     bf16  fc2 / fc3 weights (zero padded), fb* biases f32
    o_ref  : [1, 8, 128] f32      logits (8 identical rows, first 10 lanes valid)
    """
    # Load the four row-phase slabs of the input once (each [8, 128] bf16, ~2 KB).
    xq = [x4_ref[0, q] for q in range(4)]

    # ---- conv1 (5x5, 3->6) + bias + ReLU + 2x2 maxpool, split by pooled-row parity e ----
    # p1[e][i', j*6+co] = maxpool(relu(conv1+b1))[2*i'+e, j, co]   (i'<7, j<14, co<6)
    # relu(max_{dy,dx}(conv)+b) == maxpool(relu(conv+b)) since bias/ReLU are monotone.
    p1 = []
    for e in range(2):
        best = None
        for dy in range(2):
            acc = None
            for kh in range(5):
                s = 2 * e + dy + kh                # image row = 4*i' + s
                q, o = s % 4, s // 4
                lhs = xq[q][o:o + 7, :]            # [7, 128]  unit-stride row slice
                t = jnp.dot(lhs, a1_ref[kh], preferred_element_type=jnp.float32)  # [7, 256]
                acc = t if acc is None else acc + t
            cur = jnp.maximum(acc[:, :LANE], acc[:, LANE:])          # max over width phase dx
            best = cur if best is None else jnp.maximum(best, cur)   # max over height phase dy
        p1.append(jnp.maximum(best + b1_ref[...], 0.0).astype(jnp.bfloat16))     # [7, 128]

    # ---- conv2 (5x5, 6->16) + bias + ReLU + 2x2 maxpool ----
    # p2[i2, u*16+co] = maxpool(relu(conv2+b2))[i2, u, co]   (i2<5, u<5, co<16)
    best = None
    for dy in range(2):
        acc = None
        for kh in range(5):
            e, o = (dy + kh) % 2, (dy + kh) // 2
            lhs = p1[e][o:o + 5, :]                # [5, 128]
            t = jnp.dot(lhs, a2_ref[kh], preferred_element_type=jnp.float32)     # [5, 256]
            acc = t if acc is None else acc + t
        cur = jnp.maximum(acc[:, :LANE], acc[:, LANE:])
        best = cur if best is None else jnp.maximum(best, cur)
    p2 = jnp.maximum(best + b2_ref[...], 0.0).astype(jnp.bfloat16)               # [5, 128]

    # ---- fc1 -> relu -> fc2 -> relu -> fc3 ----
    # Keep M = 8 (aligned sublanes) by broadcasting the single sample across rows;
    # fc1 is a sum over the 5 pooled2 rows so no sublane->lane reshape is needed.
    acc = None
    for i2 in range(5):
        row = jnp.broadcast_to(p2[i2:i2 + 1, :], (8, LANE))                      # [8, 128]
        t = jnp.dot(row, fw1_ref[i2], preferred_element_type=jnp.float32)
        acc = t if acc is None else acc + t
    h = jnp.maximum(acc + fb1_ref[...], 0.0).astype(jnp.bfloat16)                # [8, 128]
    h = jnp.maximum(jnp.dot(h, fw2_ref[...], preferred_element_type=jnp.float32)
                    + fb2_ref[...], 0.0).astype(jnp.bfloat16)                    # [8, 128]
    logits = (jnp.dot(h, fw3_ref[...], preferred_element_type=jnp.float32)
              + fb3_ref[...])                                                    # [8, 128]
    o_ref[0] = logits


# --------------------------------- wrappers -----------------------------------

def _prep_input(x):
    """NCHW f32 [B,3,32,32] -> [B,4,8,128] bf16 with [:, q, m, :] = image row 4m+q,
    lane = w*3 + ci (lanes 96..127 zero).  Pure relayout of the raw ~12 KB/sample input."""
    B = x.shape[0]
    a = jnp.transpose(x, (0, 2, 3, 1)).reshape(B, 32, 96)          # row h, lane = w*3 + ci
    a = jnp.pad(a, ((0, 0), (0, 0), (0, LANE - 96)))               # [B, 32, 128]
    a = a.reshape(B, 8, 4, LANE).transpose(0, 2, 1, 3)             # [B, 4, 8, 128]
    return a.astype(jnp.bfloat16)


def net_forward(prep, x):
    """x: NCHW float32 [B, 3, 32, 32].  Returns [B, 10] float32 logits."""
    B = x.shape[0]
    x4 = _prep_input(x)

    def full(shape):
        return pl.BlockSpec(shape, lambda b, _n=len(shape): (0,) * _n)

    out = pl.pallas_call(
        _fused_net_kernel,
        out_shape=jax.ShapeDtypeStruct((B, 8, LANE), jnp.float32),
        grid=(B,),
        in_specs=[
            pl.BlockSpec((1, 4, 8, LANE), lambda b: (b, 0, 0, 0)),
            full((5, LANE, 2 * LANE)), full((1, LANE)),       # conv1
            full((5, LANE, 2 * LANE)), full((1, LANE)),       # conv2
            full((5, LANE, LANE)), full((1, LANE)),           # fc1
            full((LANE, LANE)), full((1, LANE)),              # fc2
            full((LANE, LANE)), full((1, LANE)),              # fc3
        ],
        out_specs=pl.BlockSpec((1, 8, LANE), lambda b: (b, 0, 0)),
        compiler_params=pltpu.CompilerParams(
            dimension_semantics=("parallel",),
            vmem_limit_bytes=32 * 1024 * 1024),
    )(x4, prep["a1"], prep["b1r"], prep["a2"], prep["b2r"],
      prep["fw1"], prep["fb1"], prep["fw2"], prep["fb2"],
      prep["fw3"], prep["fb3"])
    return out[:, 0, :10]


# ----------------------------- parameter handling ------------------------------

def init_params(key):
    """PyTorch-layout params with PyTorch-default-like uniform(-1/sqrt(fan_in), +)."""
    def uniform(k, shape, fan_in):
        bound = 1.0 / np.sqrt(float(fan_in))
        return jax.random.uniform(k, shape, jnp.float32, -bound, bound)

    ks = jax.random.split(key, 10)
    return {
        "conv1_w": uniform(ks[0], (6, 3, 5, 5), 3 * 25),
        "conv1_b": uniform(ks[1], (6,), 3 * 25),
        "conv2_w": uniform(ks[2], (16, 6, 5, 5), 6 * 25),
        "conv2_b": uniform(ks[3], (16,), 6 * 25),
        "fc1_w": uniform(ks[4], (120, 400), 400),
        "fc1_b": uniform(ks[5], (120,), 400),
        "fc2_w": uniform(ks[6], (84, 120), 120),
        "fc2_b": uniform(ks[7], (84,), 120),
        "fc3_w": uniform(ks[8], (10, 84), 84),
        "fc3_b": uniform(ks[9], (10,), 84),
    }


def prepare_params(params):
    """One-time host-side repack into the banded row-conv / permuted fc layouts."""
    w1 = np.asarray(params["conv1_w"], np.float32)   # [co=6, ci=3, kh, kw]
    w2 = np.asarray(params["conv2_w"], np.float32)   # [co=16, ci=6, kh, kw]

    # conv1: A1[kh][w*3+ci, dx*128 + j*6+co] = w1[co, ci, kh, w - (2j+dx)]
    a1 = np.zeros((5, LANE, 2 * LANE), np.float32)
    for kh in range(5):
        for dx in range(2):
            for kw in range(5):
                tap = w1[:, :, kh, kw].T             # [ci, co] = [3, 6]
                for j in range(14):
                    w = 2 * j + dx + kw              # input column, < 32
                    a1[kh, w * 3:w * 3 + 3, dx * LANE + j * 6: dx * LANE + j * 6 + 6] = tap
    b1r = np.zeros((1, LANE), np.float32)
    b1r[0, :84] = np.tile(np.asarray(params["conv1_b"], np.float32), 14)

    # conv2: A2[kh][w*6+ci, dx*128 + u*16+co] = w2[co, ci, kh, w - (2u+dx)]
    a2 = np.zeros((5, LANE, 2 * LANE), np.float32)
    for kh in range(5):
        for dx in range(2):
            for kw in range(5):
                tap = w2[:, :, kh, kw].T             # [ci, co] = [6, 16]
                for u in range(5):
                    w = 2 * u + dx + kw              # pooled1 column, < 14
                    a2[kh, w * 6:w * 6 + 6, dx * LANE + u * 16: dx * LANE + u * 16 + 16] = tap
    b2r = np.zeros((1, LANE), np.float32)
    b2r[0, :80] = np.tile(np.asarray(params["conv2_b"], np.float32), 5)

    # fc1: split by pooled2 row i2, permute PyTorch's NCHW flatten (co*25 + i2*5 + u)
    # onto the in-kernel lane layout (u*16 + co).
    fc1_w = np.asarray(params["fc1_w"], np.float32)  # [120, 400]
    fw1 = np.zeros((5, LANE, LANE), np.float32)
    for i2 in range(5):
        for u in range(5):
            for co in range(16):
                fw1[i2, u * 16 + co, :120] = fc1_w[:, co * 25 + i2 * 5 + u]
    fb1 = np.zeros((1, LANE), np.float32)
    fb1[0, :120] = np.asarray(params["fc1_b"], np.float32)

    fw2 = np.zeros((LANE, LANE), np.float32)
    fw2[:120, :84] = np.asarray(params["fc2_w"], np.float32).T
    fb2 = np.zeros((1, LANE), np.float32)
    fb2[0, :84] = np.asarray(params["fc2_b"], np.float32)
    fw3 = np.zeros((LANE, LANE), np.float32)
    fw3[:84, :10] = np.asarray(params["fc3_w"], np.float32).T
    fb3 = np.zeros((1, LANE), np.float32)
    fb3[0, :10] = np.asarray(params["fc3_b"], np.float32)

    bf = lambda a: jnp.asarray(a, jnp.bfloat16)
    f32 = lambda a: jnp.asarray(a, jnp.float32)
    return dict(a1=bf(a1), b1r=f32(b1r), a2=bf(a2), b2r=f32(b2r),
                fw1=bf(fw1), fb1=f32(fb1), fw2=bf(fw2), fb2=f32(fb2),
                fw3=bf(fw3), fb3=f32(fb3))


# ---------------------------------- reference ----------------------------------

def net_forward_reference(params, x):
    """Pure-JAX f32 reference of the PyTorch forward (sanity check)."""
    def conv(x, w, b):
        y = jax.lax.conv_general_dilated(
            x, w, (1, 1), 'VALID',
            dimension_numbers=('NCHW', 'OIHW', 'NCHW'),
            precision=jax.lax.Precision.HIGHEST)
        return jnp.maximum(y + b.reshape(1, -1, 1, 1), 0.0)

    def pool(x):
        return jax.lax.reduce_window(x, -jnp.inf, jax.lax.max,
                                     (1, 1, 2, 2), (1, 1, 2, 2), 'VALID')

    x = pool(conv(x, params["conv1_w"], params["conv1_b"]))
    x = pool(conv(x, params["conv2_w"], params["conv2_b"]))
    x = x.reshape(x.shape[0], -1)
    hp = jax.lax.Precision.HIGHEST
    x = jnp.maximum(jnp.dot(x, params["fc1_w"].T, precision=hp) + params["fc1_b"], 0.0)
    x = jnp.maximum(jnp.dot(x, params["fc2_w"].T, precision=hp) + params["fc2_b"], 0.0)
    return jnp.dot(x, params["fc3_w"].T, precision=hp) + params["fc3_b"]


if __name__ == "__main__":
    key = jax.random.PRNGKey(0)
    pkey, xkey = jax.random.split(key)
    params = init_params(pkey)
    prep = prepare_params(params)
    x = jax.random.normal(xkey, (2, 3, 32, 32), jnp.float32)   # CIFAR-sized NCHW input

    out = jax.block_until_ready(jax.jit(net_forward)(prep, x))
    assert out.shape == (2, 10) and out.dtype == jnp.float32

    ref = jax.block_until_ready(net_forward_reference(params, x))
    assert jnp.allclose(out, ref, rtol=2e-2, atol=2e-2), (out, ref)

    print("KERNEL_OK")
</pallas_src>

<mosaic_0001>
module attributes {stable_mosaic.version = 11 : i64} {
  func.func @_fused_net_kernel(%arg0: i32, %arg1: memref<1x4x8x128xbf16, #tpu.memory_space<vmem>>, %arg2: memref<5x128x256xbf16, #tpu.memory_space<vmem>>, %arg3: memref<1x128xf32, #tpu.memory_space<vmem>>, %arg4: memref<5x128x256xbf16, #tpu.memory_space<vmem>>, %arg5: memref<1x128xf32, #tpu.memory_space<vmem>>, %arg6: memref<5x128x128xbf16, #tpu.memory_space<vmem>>, %arg7: memref<1x128xf32, #tpu.memory_space<vmem>>, %arg8: memref<128x128xbf16, #tpu.memory_space<vmem>>, %arg9: memref<1x128xf32, #tpu.memory_space<vmem>>, %arg10: memref<128x128xbf16, #tpu.memory_space<vmem>>, %arg11: memref<1x128xf32, #tpu.memory_space<vmem>>, %arg12: memref<1x8x128xf32, #tpu.memory_space<vmem>>) attributes {dimension_semantics = [#tpu.dimension_semantics<parallel>], iteration_bounds = array<i64: 2>, scalar_prefetch = 0 : i64, scratch_operands = 0 : i64, tpu.core_type = #tpu.core_type<tc>, window_params = [{transform_indices = @transform_0, window_bounds = array<i64: 1, 4, 8, 128>}, {pipeline_mode = #tpu.pipeline_mode<synchronous>, transform_indices = @transform_1, window_bounds = array<i64: 5, 128, 256>}, {pipeline_mode = #tpu.pipeline_mode<synchronous>, transform_indices = @transform_2, window_bounds = array<i64: 1, 128>}, {pipeline_mode = #tpu.pipeline_mode<synchronous>, transform_indices = @transform_3, window_bounds = array<i64: 5, 128, 256>}, {pipeline_mode = #tpu.pipeline_mode<synchronous>, transform_indices = @transform_4, window_bounds = array<i64: 1, 128>}, {pipeline_mode = #tpu.pipeline_mode<synchronous>, transform_indices = @transform_5, window_bounds = array<i64: 5, 128, 128>}, {pipeline_mode = #tpu.pipeline_mode<synchronous>, transform_indices = @transform_6, window_bounds = array<i64: 1, 128>}, {pipeline_mode = #tpu.pipeline_mode<synchronous>, transform_indices = @transform_7, window_bounds = array<i64: 128, 128>}, {pipeline_mode = #tpu.pipeline_mode<synchronous>, transform_indices = @transform_8, window_bounds = array<i64: 1, 128>}, {pipeline_mode = #tpu.pipeline_mode<synchronous>, transform_indices = @transform_9, window_bounds = array<i64: 128, 128>}, {pipeline_mode = #tpu.pipeline_mode<synchronous>, transform_indices = @transform_10, window_bounds = array<i64: 1, 128>}, {transform_indices = @transform_11, window_bounds = array<i64: 1, 8, 128>}]} {
    %c0 = arith.constant 0 : index
    %c0_0 = arith.constant 0 : index
    %c0_1 = arith.constant 0 : index
    %c0_2 = arith.constant 0 : index
    %0 = vector.load %arg1[%c0, %c0_0, %c0_1, %c0_2] : memref<1x4x8x128xbf16, #tpu.memory_space<vmem>>, vector<1x1x8x128xbf16>
    %1 = vector.shape_cast %0 : vector<1x1x8x128xbf16> to vector<8x128xbf16>
    %c0_3 = arith.constant 0 : index
    %c1 = arith.constant 1 : index
    %c0_4 = arith.constant 0 : index
    %c0_5 = arith.constant 0 : index
    %2 = vector.load %arg1[%c0_3, %c1, %c0_4, %c0_5] : memref<1x4x8x128xbf16, #tpu.memory_space<vmem>>, vector<1x1x8x128xbf16>
    %3 = vector.shape_cast %2 : vector<1x1x8x128xbf16> to vector<8x128xbf16>
    %c0_6 = arith.constant 0 : index
    %c2 = arith.constant 2 : index
    %c0_7 = arith.constant 0 : index
    %c0_8 = arith.constant 0 : index
    %4 = vector.load %arg1[%c0_6, %c2, %c0_7, %c0_8] : memref<1x4x8x128xbf16, #tpu.memory_space<vmem>>, vector<1x1x8x128xbf16>
    %5 = vector.shape_cast %4 : vector<1x1x8x128xbf16> to vector<8x128xbf16>
    %c0_9 = arith.constant 0 : index
    %c3 = arith.constant 3 : index
    %c0_10 = arith.constant 0 : index
    %c0_11 = arith.constant 0 : index
    %6 = vector.load %arg1[%c0_9, %c3, %c0_10, %c0_11] : memref<1x4x8x128xbf16, #tpu.memory_space<vmem>>, vector<1x1x8x128xbf16>
    %7 = vector.shape_cast %6 : vector<1x1x8x128xbf16> to vector<8x128xbf16>
    %8 = vector.extract_strided_slice %1 {offsets = [0, 0], sizes = [7, 128], strides = [1, 1]} : vector<8x128xbf16> to vector<7x128xbf16>
    %c0_12 = arith.constant 0 : index
    %c0_13 = arith.constant 0 : index
    %c0_14 = arith.constant 0 : index
    %9 = vector.load %arg2[%c0_12, %c0_13, %c0_14] : memref<5x128x256xbf16, #tpu.memory_space<vmem>>, vector<1x128x256xbf16>
    %10 = vector.shape_cast %9 : vector<1x128x256xbf16> to vector<128x256xbf16>
    %cst = arith.constant dense<0.000000e+00> : vector<7x256xf32>
    %11 = tpu.matmul %8, %10, %cst {dimension_numbers = #tpu.dot_dimension_numbers<[1], [0], [0], [1], [0, 0, 1, 1], [], []>} : vector<7x128xbf16>, vector<128x256xbf16>, vector<7x256xf32> -> vector<7x256xf32>
    %12 = vector.extract_strided_slice %3 {offsets = [0, 0], sizes = [7, 128], strides = [1, 1]} : vector<8x128xbf16> to vector<7x128xbf16>
    %c1_15 = arith.constant 1 : index
    %c0_16 = arith.constant 0 : index
    %c0_17 = arith.constant 0 : index
    %13 = vector.load %arg2[%c1_15, %c0_16, %c0_17] : memref<5x128x256xbf16, #tpu.memory_space<vmem>>, vector<1x128x256xbf16>
    %14 = vector.shape_cast %13 : vector<1x128x256xbf16> to vector<128x256xbf16>
    %cst_18 = arith.constant dense<0.000000e+00> : vector<7x256xf32>
    %15 = tpu.matmul %12, %14, %cst_18 {dimension_numbers = #tpu.dot_dimension_numbers<[1], [0], [0], [1], [0, 0, 1, 1], [], []>} : vector<7x128xbf16>, vector<128x256xbf16>, vector<7x256xf32> -> vector<7x256xf32>
    %16 = arith.addf %11, %15 : vector<7x256xf32>
    %17 = vector.extract_strided_slice %5 {offsets = [0, 0], sizes = [7, 128], strides = [1, 1]} : vector<8x128xbf16> to vector<7x128xbf16>
    %c2_19 = arith.constant 2 : index
    %c0_20 = arith.constant 0 : index
    %c0_21 = arith.constant 0 : index
    %18 = vector.load %arg2[%c2_19, %c0_20, %c0_21] : memref<5x128x256xbf16, #tpu.memory_space<vmem>>, vector<1x128x256xbf16>
    %19 = vector.shape_cast %18 : vector<1x128x256xbf16> to vector<128x256xbf16>
    %cst_22 = arith.constant dense<0.000000e+00> : vector<7x256xf32>
    %20 = tpu.matmul %17, %19, %cst_22 {dimension_numbers = #tpu.dot_dimension_numbers<[1], [0], [0], [1], [0, 0, 1, 1], [], []>} : vector<7x128xbf16>, vector<128x256xbf16>, vector<7x256xf32> -> vector<7x256xf32>
    %21 = arith.addf %16, %20 : vector<7x256xf32>
    %22 = vector.extract_strided_slice %7 {offsets = [0, 0], sizes = [7, 128], strides = [1, 1]} : vector<8x128xbf16> to vector<7x128xbf16>
    %c3_23 = arith.constant 3 : index
    %c0_24 = arith.constant 0 : index
    %c0_25 = arith.constant 0 : index
    %23 = vector.load %arg2[%c3_23, %c0_24, %c0_25] : memref<5x128x256xbf16, #tpu.memory_space<vmem>>, vector<1x128x256xbf16>
    %24 = vector.shape_cast %23 : vector<1x128x256xbf16> to vector<128x256xbf16>
    %cst_26 = arith.constant dense<0.000000e+00> : vector<7x256xf32>
    %25 = tpu.matmul %22, %24, %cst_26 {dimension_numbers = #tpu.dot_dimension_numbers<[1], [0], [0], [1], [0, 0, 1, 1], [], []>} : vector<7x128xbf16>, vector<128x256xbf16>, vector<7x256xf32> -> vector<7x256xf32>
    %26 = arith.addf %21, %25 : vector<7x256xf32>
    %27 = vector.extract_strided_slice %1 {offsets = [1, 0], sizes = [7, 128], strides = [1, 1]} : vector<8x128xbf16> to vector<7x128xbf16>
    %c4 = arith.constant 4 : index
    %c0_27 = arith.constant 0 : index
    %c0_28 = arith.constant 0 : index
    %28 = vector.load %arg2[%c4, %c0_27, %c0_28] : memref<5x128x256xbf16, #tpu.memory_space<vmem>>, vector<1x128x256xbf16>
    %29 = vector.shape_cast %28 : vector<1x128x256xbf16> to vector<128x256xbf16>
    %cst_29 = arith.constant dense<0.000000e+00> : vector<7x256xf32>
    %30 = tpu.matmul %27, %29, %cst_29 {dimension_numbers = #tpu.dot_dimension_numbers<[1], [0], [0], [1], [0, 0, 1, 1], [], []>} : vector<7x128xbf16>, vector<128x256xbf16>, vector<7x256xf32> -> vector<7x256xf32>
    %31 = arith.addf %26, %30 : vector<7x256xf32>
    %32 = vector.extract_strided_slice %31 {offsets = [0, 0], sizes = [7, 128], strides = [1, 1]} : vector<7x256xf32> to vector<7x128xf32>
    %33 = vector.extract_strided_slice %31 {offsets = [0, 128], sizes = [7, 128], strides = [1, 1]} : vector<7x256xf32> to vector<7x128xf32>
    %34 = arith.maximumf %32, %33 : vector<7x128xf32>
    %35 = vector.extract_strided_slice %3 {offsets = [0, 0], sizes = [7, 128], strides = [1, 1]} : vector<8x128xbf16> to vector<7x128xbf16>
    %c0_30 = arith.constant 0 : index
    %c0_31 = arith.constant 0 : index
    %c0_32 = arith.constant 0 : index
    %36 = vector.load %arg2[%c0_30, %c0_31, %c0_32] : memref<5x128x256xbf16, #tpu.memory_space<vmem>>, vector<1x128x256xbf16>
    %37 = vector.shape_cast %36 : vector<1x128x256xbf16> to vector<128x256xbf16>
    %cst_33 = arith.constant dense<0.000000e+00> : vector<7x256xf32>
    %38 = tpu.matmul %35, %37, %cst_33 {dimension_numbers = #tpu.dot_dimension_numbers<[1], [0], [0], [1], [0, 0, 1, 1], [], []>} : vector<7x128xbf16>, vector<128x256xbf16>, vector<7x256xf32> -> vector<7x256xf32>
    %39 = vector.extract_strided_slice %5 {offsets = [0, 0], sizes = [7, 128], strides = [1, 1]} : vector<8x128xbf16> to vector<7x128xbf16>
    %c1_34 = arith.constant 1 : index
    %c0_35 = arith.constant 0 : index
    %c0_36 = arith.constant 0 : index
    %40 = vector.load %arg2[%c1_34, %c0_35, %c0_36] : memref<5x128x256xbf16, #tpu.memory_space<vmem>>, vector<1x128x256xbf16>
    %41 = vector.shape_cast %40 : vector<1x128x256xbf16> to vector<128x256xbf16>
    %cst_37 = arith.constant dense<0.000000e+00> : vector<7x256xf32>
    %42 = tpu.matmul %39, %41, %cst_37 {dimension_numbers = #tpu.dot_dimension_numbers<[1], [0], [0], [1], [0, 0, 1, 1], [], []>} : vector<7x128xbf16>, vector<128x256xbf16>, vector<7x256xf32> -> vector<7x256xf32>
    %43 = arith.addf %38, %42 : vector<7x256xf32>
    %44 = vector.extract_strided_slice %7 {offsets = [0, 0], sizes = [7, 128], strides = [1, 1]} : vector<8x128xbf16> to vector<7x128xbf16>
    %c2_38 = arith.constant 2 : index
    %c0_39 = arith.constant 0 : index
    %c0_40 = arith.constant 0 : index
    %45 = vector.load %arg2[%c2_38, %c0_39, %c0_40] : memref<5x128x256xbf16, #tpu.memory_space<vmem>>, vector<1x128x256xbf16>
    %46 = vector.shape_cast %45 : vector<1x128x256xbf16> to vector<128x256xbf16>
    %cst_41 = arith.constant dense<0.000000e+00> : vector<7x256xf32>
    %47 = tpu.matmul %44, %46, %cst_41 {dimension_numbers = #tpu.dot_dimension_numbers<[1], [0], [0], [1], [0, 0, 1, 1], [], []>} : vector<7x128xbf16>, vector<128x256xbf16>, vector<7x256xf32> -> vector<7x256xf32>
    %48 = arith.addf %43, %47 : vector<7x256xf32>
    %49 = vector.extract_strided_slice %1 {offsets = [1, 0], sizes = [7, 128], strides = [1, 1]} : vector<8x128xbf16> to vector<7x128xbf16>
    %c3_42 = arith.constant 3 : index
    %c0_43 = arith.constant 0 : index
    %c0_44 = arith.constant 0 : index
    %50 = vector.load %arg2[%c3_42, %c0_43, %c0_44] : memref<5x128x256xbf16, #tpu.memory_space<vmem>>, vector<1x128x256xbf16>
    %51 = vector.shape_cast %50 : vector<1x128x256xbf16> to vector<128x256xbf16>
    %cst_45 = arith.constant dense<0.000000e+00> : vector<7x256xf32>
    %52 = tpu.matmul %49, %51, %cst_45 {dimension_numbers = #tpu.dot_dimension_numbers<[1], [0], [0], [1], [0, 0, 1, 1], [], []>} : vector<7x128xbf16>, vector<128x256xbf16>, vector<7x256xf32> -> vector<7x256xf32>
    %53 = arith.addf %48, %52 : vector<7x256xf32>
    %54 = vector.extract_strided_slice %3 {offsets = [1, 0], sizes = [7, 128], strides = [1, 1]} : vector<8x128xbf16> to vector<7x128xbf16>
    %c4_46 = arith.constant 4 : index
    %c0_47 = arith.constant 0 : index
    %c0_48 = arith.constant 0 : index
    %55 = vector.load %arg2[%c4_46, %c0_47, %c0_48] : memref<5x128x256xbf16, #tpu.memory_space<vmem>>, vector<1x128x256xbf16>
    %56 = vector.shape_cast %55 : vector<1x128x256xbf16> to vector<128x256xbf16>
    %cst_49 = arith.constant dense<0.000000e+00> : vector<7x256xf32>
    %57 = tpu.matmul %54, %56, %cst_49 {dimension_numbers = #tpu.dot_dimension_numbers<[1], [0], [0], [1], [0, 0, 1, 1], [], []>} : vector<7x128xbf16>, vector<128x256xbf16>, vector<7x256xf32> -> vector<7x256xf32>
    %58 = arith.addf %53, %57 : vector<7x256xf32>
    %59 = vector.extract_strided_slice %58 {offsets = [0, 0], sizes = [7, 128], strides = [1, 1]} : vector<7x256xf32> to vector<7x128xf32>
    %60 = vector.extract_strided_slice %58 {offsets = [0, 128], sizes = [7, 128], strides = [1, 1]} : vector<7x256xf32> to vector<7x128xf32>
    %61 = arith.maximumf %59, %60 : vector<7x128xf32>
    %62 = arith.maximumf %34, %61 : vector<7x128xf32>
    %c0_50 = arith.constant 0 : index
    %c0_51 = arith.constant 0 : index
    %63 = vector.load %arg3[%c0_50, %c0_51] : memref<1x128xf32, #tpu.memory_space<vmem>>, vector<1x128xf32>
    %64 = vector.broadcast %63 : vector<1x128xf32> to vector<7x128xf32>
    %65 = arith.addf %62, %64 : vector<7x128xf32>
    %cst_52 = arith.constant 0.000000e+00 : f32
    %66 = vector.broadcast %cst_52 : f32 to vector<7x128xf32>
    %67 = arith.maximumf %65, %66 : vector<7x128xf32>
    %68 = arith.truncf %67 : vector<7x128xf32> to vector<7x128xbf16>
    %69 = vector.extract_strided_slice %5 {offsets = [0, 0], sizes = [7, 128], strides = [1, 1]} : vector<8x128xbf16> to vector<7x128xbf16>
    %c0_53 = arith.constant 0 : index
    %c0_54 = arith.constant 0 : index
    %c0_55 = arith.constant 0 : index
    %70 = vector.load %arg2[%c0_53, %c0_54, %c0_55] : memref<5x128x256xbf16, #tpu.memory_space<vmem>>, vector<1x128x256xbf16>
    %71 = vector.shape_cast %70 : vector<1x128x256xbf16> to vector<128x256xbf16>
    %cst_56 = arith.constant dense<0.000000e+00> : vector<7x256xf32>
    %72 = tpu.matmul %69, %71, %cst_56 {dimension_numbers = #tpu.dot_dimension_numbers<[1], [0], [0], [1], [0, 0, 1, 1], [], []>} : vector<7x128xbf16>, vector<128x256xbf16>, vector<7x256xf32> -> vector<7x256xf32>
    %73 = vector.extract_strided_slice %7 {offsets = [0, 0], sizes = [7, 128], strides = [1, 1]} : vector<8x128xbf16> to vector<7x128xbf16>
    %c1_57 = arith.constant 1 : index
    %c0_58 = arith.constant 0 : index
    %c0_59 = arith.constant 0 : index
    %74 = vector.load %arg2[%c1_57, %c0_58, %c0_59] : memref<5x128x256xbf16, #tpu.memory_space<vmem>>, vector<1x128x256xbf16>
    %75 = vector.shape_cast %74 : vector<1x128x256xbf16> to vector<128x256xbf16>
    %cst_60 = arith.constant dense<0.000000e+00> : vector<7x256xf32>
    %76 = tpu.matmul %73, %75, %cst_60 {dimension_numbers = #tpu.dot_dimension_numbers<[1], [0], [0], [1], [0, 0, 1, 1], [], []>} : vector<7x128xbf16>, vector<128x256xbf16>, vector<7x256xf32> -> vector<7x256xf32>
    %77 = arith.addf %72, %76 : vector<7x256xf32>
    %78 = vector.extract_strided_slice %1 {offsets = [1, 0], sizes = [7, 128], strides = [1, 1]} : vector<8x128xbf16> to vector<7x128xbf16>
    %c2_61 = arith.constant 2 : index
    %c0_62 = arith.constant 0 : index
    %c0_63 = arith.constant 0 : index
    %79 = vector.load %arg2[%c2_61, %c0_62, %c0_63] : memref<5x128x256xbf16, #tpu.memory_space<vmem>>, vector<1x128x256xbf16>
    %80 = vector.shape_cast %79 : vector<1x128x256xbf16> to vector<128x256xbf16>
    %cst_64 = arith.constant dense<0.000000e+00> : vector<7x256xf32>
    %81 = tpu.matmul %78, %80, %cst_64 {dimension_numbers = #tpu.dot_dimension_numbers<[1], [0], [0], [1], [0, 0, 1, 1], [], []>} : vector<7x128xbf16>, vector<128x256xbf16>, vector<7x256xf32> -> vector<7x256xf32>
    %82 = arith.addf %77, %81 : vector<7x256xf32>
    %83 = vector.extract_strided_slice %3 {offsets = [1, 0], sizes = [7, 128], strides = [1, 1]} : vector<8x128xbf16> to vector<7x128xbf16>
    %c3_65 = arith.constant 3 : index
    %c0_66 = arith.constant 0 : index
    %c0_67 = arith.constant 0 : index
    %84 = vector.load %arg2[%c3_65, %c0_66, %c0_67] : memref<5x128x256xbf16, #tpu.memory_space<vmem>>, vector<1x128x256xbf16>
    %85 = vector.shape_cast %84 : vector<1x128x256xbf16> to vector<128x256xbf16>
    %cst_68 = arith.constant dense<0.000000e+00> : vector<7x256xf32>
    %86 = tpu.matmul %83, %85, %cst_68 {dimension_numbers = #tpu.dot_dimension_numbers<[1], [0], [0], [1], [0, 0, 1, 1], [], []>} : vector<7x128xbf16>, vector<128x256xbf16>, vector<7x256xf32> -> vector<7x256xf32>
    %87 = arith.addf %82, %86 : vector<7x256xf32>
    %88 = vector.extract_strided_slice %5 {offsets = [1, 0], sizes = [7, 128], strides = [1, 1]} : vector<8x128xbf16> to vector<7x128xbf16>
    %c4_69 = arith.constant 4 : index
    %c0_70 = arith.constant 0 : index
    %c0_71 = arith.constant 0 : index
    %89 = vector.load %arg2[%c4_69, %c0_70, %c0_71] : memref<5x128x256xbf16, #tpu.memory_space<vmem>>, vector<1x128x256xbf16>
    %90 = vector.shape_cast %89 : vector<1x128x256xbf16> to vector<128x256xbf16>
    %cst_72 = arith.constant dense<0.000000e+00> : vector<7x256xf32>
    %91 = tpu.matmul %88, %90, %cst_72 {dimension_numbers = #tpu.dot_dimension_numbers<[1], [0], [0], [1], [0, 0, 1, 1], [], []>} : vector<7x128xbf16>, vector<128x256xbf16>, vector<7x256xf32> -> vector<7x256xf32>
    %92 = arith.addf %87, %91 : vector<7x256xf32>
    %93 = vector.extract_strided_slice %92 {offsets = [0, 0], sizes = [7, 128], strides = [1, 1]} : vector<7x256xf32> to vector<7x128xf32>
    %94 = vector.extract_strided_slice %92 {offsets = [0, 128], sizes = [7, 128], strides = [1, 1]} : vector<7x256xf32> to vector<7x128xf32>
    %95 = arith.maximumf %93, %94 : vector<7x128xf32>
    %96 = vector.extract_strided_slice %7 {offsets = [0, 0], sizes = [7, 128], strides = [1, 1]} : vector<8x128xbf16> to vector<7x128xbf16>
    %c0_73 = arith.constant 0 : index
    %c0_74 = arith.constant 0 : index
    %c0_75 = arith.constant 0 : index
    %97 = vector.load %arg2[%c0_73, %c0_74, %c0_75] : memref<5x128x256xbf16, #tpu.memory_space<vmem>>, vector<1x128x256xbf16>
    %98 = vector.shape_cast %97 : vector<1x128x256xbf16> to vector<128x256xbf16>
    %cst_76 = arith.constant dense<0.000000e+00> : vector<7x256xf32>
    %99 = tpu.matmul %96, %98, %cst_76 {dimension_numbers = #tpu.dot_dimension_numbers<[1], [0], [0], [1], [0, 0, 1, 1], [], []>} : vector<7x128xbf16>, vector<128x256xbf16>, vector<7x256xf32> -> vector<7x256xf32>
    %100 = vector.extract_strided_slice %1 {offsets = [1, 0], sizes = [7, 128], strides = [1, 1]} : vector<8x128xbf16> to vector<7x128xbf16>
    %c1_77 = arith.constant 1 : index
    %c0_78 = arith.constant 0 : index
    %c0_79 = arith.constant 0 : index
    %101 = vector.load %arg2[%c1_77, %c0_78, %c0_79] : memref<5x128x256xbf16, #tpu.memory_space<vmem>>, vector<1x128x256xbf16>
    %102 = vector.shape_cast %101 : vector<1x128x256xbf16> to vector<128x256xbf16>
    %cst_80 = arith.constant dense<0.000000e+00> : vector<7x256xf32>
    %103 = tpu.matmul %100, %102, %cst_80 {dimension_numbers = #tpu.dot_dimension_numbers<[1], [0], [0], [1], [0, 0, 1, 1], [], []>} : vector<7x128xbf16>, vector<128x256xbf16>, vector<7x256xf32> -> vector<7x256xf32>
    %104 = arith.addf %99, %103 : vector<7x256xf32>
    %105 = vector.extract_strided_slice %3 {offsets = [1, 0], sizes = [7, 128], strides = [1, 1]} : vector<8x128xbf16> to vector<7x128xbf16>
    %c2_81 = arith.constant 2 : index
    %c0_82 = arith.constant 0 : index
    %c0_83 = arith.constant 0 : index
    %106 = vector.load %arg2[%c2_81, %c0_82, %c0_83] : memref<5x128x256xbf16, #tpu.memory_space<vmem>>, vector<1x128x256xbf16>
    %107 = vector.shape_cast %106 : vector<1x128x256xbf16> to vector<128x256xbf16>
    %cst_84 = arith.constant dense<0.000000e+00> : vector<7x256xf32>
    %108 = tpu.matmul %105, %107, %cst_84 {dimension_numbers = #tpu.dot_dimension_numbers<[1], [0], [0], [1], [0, 0, 1, 1], [], []>} : vector<7x128xbf16>, vector<128x256xbf16>, vector<7x256xf32> -> vector<7x256xf32>
    %109 = arith.addf %104, %108 : vector<7x256xf32>
    %110 = vector.extract_strided_slice %5 {offsets = [1, 0], sizes = [7, 128], strides = [1, 1]} : vector<8x128xbf16> to vector<7x128xbf16>
    %c3_85 = arith.constant 3 : index
    %c0_86 = arith.constant 0 : index
    %c0_87 = arith.constant 0 : index
    %111 = vector.load %arg2[%c3_85, %c0_86, %c0_87] : memref<5x128x256xbf16, #tpu.memory_space<vmem>>, vector<1x128x256xbf16>
    %112 = vector.shape_cast %111 : vector<1x128x256xbf16> to vector<128x256xbf16>
    %cst_88 = arith.constant dense<0.000000e+00> : vector<7x256xf32>
    %113 = tpu.matmul %110, %112, %cst_88 {dimension_numbers = #tpu.dot_dimension_numbers<[1], [0], [0], [1], [0, 0, 1, 1], [], []>} : vector<7x128xbf16>, vector<128x256xbf16>, vector<7x256xf32> -> vector<7x256xf32>
    %114 = arith.addf %109, %113 : vector<7x256xf32>
    %115 = vector.extract_strided_slice %7 {offsets = [1, 0], sizes = [7, 128], strides = [1, 1]} : vector<8x128xbf16> to vector<7x128xbf16>
    %c4_89 = arith.constant 4 : index
    %c0_90 = arith.constant 0 : index
    %c0_91 = arith.constant 0 : index
    %116 = vector.load %arg2[%c4_89, %c0_90, %c0_91] : memref<5x128x256xbf16, #tpu.memory_space<vmem>>, vector<1x128x256xbf16>
    %117 = vector.shape_cast %116 : vector<1x128x256xbf16> to vector<128x256xbf16>
    %cst_92 = arith.constant dense<0.000000e+00> : vector<7x256xf32>
    %118 = tpu.matmul %115, %117, %cst_92 {dimension_numbers = #tpu.dot_dimension_numbers<[1], [0], [0], [1], [0, 0, 1, 1], [], []>} : vector<7x128xbf16>, vector<128x256xbf16>, vector<7x256xf32> -> vector<7x256xf32>
    %119 = arith.addf %114, %118 : vector<7x256xf32>
    %120 = vector.extract_strided_slice %119 {offsets = [0, 0], sizes = [7, 128], strides = [1, 1]} : vector<7x256xf32> to vector<7x128xf32>
    %121 = vector.extract_strided_slice %119 {offsets = [0, 128], sizes = [7, 128], strides = [1, 1]} : vector<7x256xf32> to vector<7x128xf32>
    %122 = arith.maximumf %120, %121 : vector<7x128xf32>
    %123 = arith.maximumf %95, %122 : vector<7x128xf32>
    %c0_93 = arith.constant 0 : index
    %c0_94 = arith.constant 0 : index
    %124 = vector.load %arg3[%c0_93, %c0_94] : memref<1x128xf32, #tpu.memory_space<vmem>>, vector<1x128xf32>
    %125 = vector.broadcast %124 : vector<1x128xf32> to vector<7x128xf32>
    %126 = arith.addf %123, %125 : vector<7x128xf32>
    %cst_95 = arith.constant 0.000000e+00 : f32
    %127 = vector.broadcast %cst_95 : f32 to vector<7x128xf32>
    %128 = arith.maximumf %126, %127 : vector<7x128xf32>
    %129 = arith.truncf %128 : vector<7x128xf32> to vector<7x128xbf16>
    %130 = vector.extract_strided_slice %68 {offsets = [0, 0], sizes = [5, 128], strides = [1, 1]} : vector<7x128xbf16> to vector<5x128xbf16>
    %c0_96 = arith.constant 0 : index
    %c0_97 = arith.constant 0 : index
    %c0_98 = arith.constant 0 : index
    %131 = vector.load %arg4[%c0_96, %c0_97, %c0_98] : memref<5x128x256xbf16, #tpu.memory_space<vmem>>, vector<1x128x256xbf16>
    %132 = vector.shape_cast %131 : vector<1x128x256xbf16> to vector<128x256xbf16>
    %cst_99 = arith.constant dense<0.000000e+00> : vector<5x256xf32>
    %133 = tpu.matmul %130, %132, %cst_99 {dimension_numbers = #tpu.dot_dimension_numbers<[1], [0], [0], [1], [0, 0, 1, 1], [], []>} : vector<5x128xbf16>, vector<128x256xbf16>, vector<5x256xf32> -> vector<5x256xf32>
    %134 = vector.extract_strided_slice %129 {offsets = [0, 0], sizes = [5, 128], strides = [1, 1]} : vector<7x128xbf16> to vector<5x128xbf16>
    %c1_100 = arith.constant 1 : index
    %c0_101 = arith.constant 0 : index
    %c0_102 = arith.constant 0 : index
    %135 = vector.load %arg4[%c1_100, %c0_101, %c0_102] : memref<5x128x256xbf16, #tpu.memory_space<vmem>>, vector<1x128x256xbf16>
    %136 = vector.shape_cast %135 : vector<1x128x256xbf16> to vector<128x256xbf16>
    %cst_103 = arith.constant dense<0.000000e+00> : vector<5x256xf32>
    %137 = tpu.matmul %134, %136, %cst_103 {dimension_numbers = #tpu.dot_dimension_numbers<[1], [0], [0], [1], [0, 0, 1, 1], [], []>} : vector<5x128xbf16>, vector<128x256xbf16>, vector<5x256xf32> -> vector<5x256xf32>
    %138 = arith.addf %133, %137 : vector<5x256xf32>
    %139 = vector.extract_strided_slice %68 {offsets = [1, 0], sizes = [5, 128], strides = [1, 1]} : vector<7x128xbf16> to vector<5x128xbf16>
    %c2_104 = arith.constant 2 : index
    %c0_105 = arith.constant 0 : index
    %c0_106 = arith.constant 0 : index
    %140 = vector.load %arg4[%c2_104, %c0_105, %c0_106] : memref<5x128x256xbf16, #tpu.memory_space<vmem>>, vector<1x128x256xbf16>
    %141 = vector.shape_cast %140 : vector<1x128x256xbf16> to vector<128x256xbf16>
    %cst_107 = arith.constant dense<0.000000e+00> : vector<5x256xf32>
    %142 = tpu.matmul %139, %141, %cst_107 {dimension_numbers = #tpu.dot_dimension_numbers<[1], [0], [0], [1], [0, 0, 1, 1], [], []>} : vector<5x128xbf16>, vector<128x256xbf16>, vector<5x256xf32> -> vector<5x256xf32>
    %143 = arith.addf %138, %142 : vector<5x256xf32>
    %144 = vector.extract_strided_slice %129 {offsets = [1, 0], sizes = [5, 128], strides = [1, 1]} : vector<7x128xbf16> to vector<5x128xbf16>
    %c3_108 = arith.constant 3 : index
    %c0_109 = arith.constant 0 : index
    %c0_110 = arith.constant 0 : index
    %145 = vector.load %arg4[%c3_108, %c0_109, %c0_110] : memref<5x128x256xbf16, #tpu.memory_space<vmem>>, vector<1x128x256xbf16>
    %146 = vector.shape_cast %145 : vector<1x128x256xbf16> to vector<128x256xbf16>
    %cst_111 = arith.constant dense<0.000000e+00> : vector<5x256xf32>
    %147 = tpu.matmul %144, %146, %cst_111 {dimension_numbers = #tpu.dot_dimension_numbers<[1], [0], [0], [1], [0, 0, 1, 1], [], []>} : vector<5x128xbf16>, vector<128x256xbf16>, vector<5x256xf32> -> vector<5x256xf32>
    %148 = arith.addf %143, %147 : vector<5x256xf32>
    %149 = vector.extract_strided_slice %68 {offsets = [2, 0], sizes = [5, 128], strides = [1, 1]} : vector<7x128xbf16> to vector<5x128xbf16>
    %c4_112 = arith.constant 4 : index
    %c0_113 = arith.constant 0 : index
    %c0_114 = arith.constant 0 : index
    %150 = vector.load %arg4[%c4_112, %c0_113, %c0_114] : memref<5x128x256xbf16, #tpu.memory_space<vmem>>, vector<1x128x256xbf16>
    %151 = vector.shape_cast %150 : vector<1x128x256xbf16> to vector<128x256xbf16>
    %cst_115 = arith.constant dense<0.000000e+00> : vector<5x256xf32>
    %152 = tpu.matmul %149, %151, %cst_115 {dimension_numbers = #tpu.dot_dimension_numbers<[1], [0], [0], [1], [0, 0, 1, 1], [], []>} : vector<5x128xbf16>, vector<128x256xbf16>, vector<5x256xf32> -> vector<5x256xf32>
    %153 = arith.addf %148, %152 : vector<5x256xf32>
    %154 = vector.extract_strided_slice %153 {offsets = [0, 0], sizes = [5, 128], strides = [1, 1]} : vector<5x256xf32> to vector<5x128xf32>
    %155 = vector.extract_strided_slice %153 {offsets = [0, 128], sizes = [5, 128], strides = [1, 1]} : vector<5x256xf32> to vector<5x128xf32>
    %156 = arith.maximumf %154, %155 : vector<5x128xf32>
    %157 = vector.extract_strided_slice %129 {offsets = [0, 0], sizes = [5, 128], strides = [1, 1]} : vector<7x128xbf16> to vector<5x128xbf16>
    %c0_116 = arith.constant 0 : index
    %c0_117 = arith.constant 0 : index
    %c0_118 = arith.constant 0 : index
    %158 = vector.load %arg4[%c0_116, %c0_117, %c0_118] : memref<5x128x256xbf16, #tpu.memory_space<vmem>>, vector<1x128x256xbf16>
    %159 = vector.shape_cast %158 : vector<1x128x256xbf16> to vector<128x256xbf16>
    %cst_119 = arith.constant dense<0.000000e+00> : vector<5x256xf32>
    %160 = tpu.matmul %157, %159, %cst_119 {dimension_numbers = #tpu.dot_dimension_numbers<[1], [0], [0], [1], [0, 0, 1, 1], [], []>} : vector<5x128xbf16>, vector<128x256xbf16>, vector<5x256xf32> -> vector<5x256xf32>
    %161 = vector.extract_strided_slice %68 {offsets = [1, 0], sizes = [5, 128], strides = [1, 1]} : vector<7x128xbf16> to vector<5x128xbf16>
    %c1_120 = arith.constant 1 : index
    %c0_121 = arith.constant 0 : index
    %c0_122 = arith.constant 0 : index
    %162 = vector.load %arg4[%c1_120, %c0_121, %c0_122] : memref<5x128x256xbf16, #tpu.memory_space<vmem>>, vector<1x128x256xbf16>
    %163 = vector.shape_cast %162 : vector<1x128x256xbf16> to vector<128x256xbf16>
    %cst_123 = arith.constant dense<0.000000e+00> : vector<5x256xf32>
    %164 = tpu.matmul %161, %163, %cst_123 {dimension_numbers = #tpu.dot_dimension_numbers<[1], [0], [0], [1], [0, 0, 1, 1], [], []>} : vector<5x128xbf16>, vector<128x256xbf16>, vector<5x256xf32> -> vector<5x256xf32>
    %165 = arith.addf %160, %164 : vector<5x256xf32>
    %166 = vector.extract_strided_slice %129 {offsets = [1, 0], sizes = [5, 128], strides = [1, 1]} : vector<7x128xbf16> to vector<5x128xbf16>
    %c2_124 = arith.constant 2 : index
    %c0_125 = arith.constant 0 : index
    %c0_126 = arith.constant 0 : index
    %167 = vector.load %arg4[%c2_124, %c0_125, %c0_126] : memref<5x128x256xbf16, #tpu.memory_space<vmem>>, vector<1x128x256xbf16>
    %168 = vector.shape_cast %167 : vector<1x128x256xbf16> to vector<128x256xbf16>
    %cst_127 = arith.constant dense<0.000000e+00> : vector<5x256xf32>
    %169 = tpu.matmul %166, %168, %cst_127 {dimension_numbers = #tpu.dot_dimension_numbers<[1], [0], [0], [1], [0, 0, 1, 1], [], []>} : vector<5x128xbf16>, vector<128x256xbf16>, vector<5x256xf32> -> vector<5x256xf32>
    %170 = arith.addf %165, %169 : vector<5x256xf32>
    %171 = vector.extract_strided_slice %68 {offsets = [2, 0], sizes = [5, 128], strides = [1, 1]} : vector<7x128xbf16> to vector<5x128xbf16>
    %c3_128 = arith.constant 3 : index
    %c0_129 = arith.constant 0 : index
    %c0_130 = arith.constant 0 : index
    %172 = vector.load %arg4[%c3_128, %c0_129, %c0_130] : memref<5x128x256xbf16, #tpu.memory_space<vmem>>, vector<1x128x256xbf16>
    %173 = vector.shape_cast %172 : vector<1x128x256xbf16> to vector<128x256xbf16>
    %cst_131 = arith.constant dense<0.000000e+00> : vector<5x256xf32>
    %174 = tpu.matmul %171, %173, %cst_131 {dimension_numbers = #tpu.dot_dimension_numbers<[1], [0], [0], [1], [0, 0, 1, 1], [], []>} : vector<5x128xbf16>, vector<128x256xbf16>, vector<5x256xf32> -> vector<5x256xf32>
    %175 = arith.addf %170, %174 : vector<5x256xf32>
    %176 = vector.extract_strided_slice %129 {offsets = [2, 0], sizes = [5, 128], strides = [1, 1]} : vector<7x128xbf16> to vector<5x128xbf16>
    %c4_132 = arith.constant 4 : index
    %c0_133 = arith.constant 0 : index
    %c0_134 = arith.constant 0 : index
    %177 = vector.load %arg4[%c4_132, %c0_133, %c0_134] : memref<5x128x256xbf16, #tpu.memory_space<vmem>>, vector<1x128x256xbf16>
    %178 = vector.shape_cast %177 : vector<1x128x256xbf16> to vector<128x256xbf16>
    %cst_135 = arith.constant dense<0.000000e+00> : vector<5x256xf32>
    %179 = tpu.matmul %176, %178, %cst_135 {dimension_numbers = #tpu.dot_dimension_numbers<[1], [0], [0], [1], [0, 0, 1, 1], [], []>} : vector<5x128xbf16>, vector<128x256xbf16>, vector<5x256xf32> -> vector<5x256xf32>
    %180 = arith.addf %175, %179 : vector<5x256xf32>
    %181 = vector.extract_strided_slice %180 {offsets = [0, 0], sizes = [5, 128], strides = [1, 1]} : vector<5x256xf32> to vector<5x128xf32>
    %182 = vector.extract_strided_slice %180 {offsets = [0, 128], sizes = [5, 128], strides = [1, 1]} : vector<5x256xf32> to vector<5x128xf32>
    %183 = arith.maximumf %181, %182 : vector<5x128xf32>
    %184 = arith.maximumf %156, %183 : vector<5x128xf32>
    %c0_136 = arith.constant 0 : index
    %c0_137 = arith.constant 0 : index
    %185 = vector.load %arg5[%c0_136, %c0_137] : memref<1x128xf32, #tpu.memory_space<vmem>>, vector<1x128xf32>
    %186 = vector.broadcast %185 : vector<1x128xf32> to vector<5x128xf32>
    %187 = arith.addf %184, %186 : vector<5x128xf32>
    %cst_138 = arith.constant 0.000000e+00 : f32
    %188 = vector.broadcast %cst_138 : f32 to vector<5x128xf32>
    %189 = arith.maximumf %187, %188 : vector<5x128xf32>
    %190 = arith.truncf %189 : vector<5x128xf32> to vector<5x128xbf16>
    %191 = vector.extract_strided_slice %190 {offsets = [0, 0], sizes = [1, 128], strides = [1, 1]} : vector<5x128xbf16> to vector<1x128xbf16>
    %192 = vector.shape_cast %191 : vector<1x128xbf16> to vector<1x128xbf16>
    %193 = vector.broadcast %192 : vector<1x128xbf16> to vector<8x128xbf16>
    %c0_139 = arith.constant 0 : index
    %c0_140 = arith.constant 0 : index
    %c0_141 = arith.constant 0 : index
    %194 = vector.load %arg6[%c0_139, %c0_140, %c0_141] : memref<5x128x128xbf16, #tpu.memory_space<vmem>>, vector<1x128x128xbf16>
    %195 = vector.shape_cast %194 : vector<1x128x128xbf16> to vector<128x128xbf16>
    %cst_142 = arith.constant dense<0.000000e+00> : vector<8x128xf32>
    %196 = tpu.matmul %193, %195, %cst_142 {dimension_numbers = #tpu.dot_dimension_numbers<[1], [0], [0], [1], [0, 0, 1, 1], [], []>} : vector<8x128xbf16>, vector<128x128xbf16>, vector<8x128xf32> -> vector<8x128xf32>
    %197 = vector.extract_strided_slice %190 {offsets = [1, 0], sizes = [1, 128], strides = [1, 1]} : vector<5x128xbf16> to vector<1x128xbf16>
    %198 = vector.shape_cast %197 : vector<1x128xbf16> to vector<1x128xbf16>
    %199 = vector.broadcast %198 : vector<1x128xbf16> to vector<8x128xbf16>
    %c1_143 = arith.constant 1 : index
    %c0_144 = arith.constant 0 : index
    %c0_145 = arith.constant 0 : index
    %200 = vector.load %arg6[%c1_143, %c0_144, %c0_145] : memref<5x128x128xbf16, #tpu.memory_space<vmem>>, vector<1x128x128xbf16>
    %201 = vector.shape_cast %200 : vector<1x128x128xbf16> to vector<128x128xbf16>
    %cst_146 = arith.constant dense<0.000000e+00> : vector<8x128xf32>
    %202 = tpu.matmul %199, %201, %cst_146 {dimension_numbers = #tpu.dot_dimension_numbers<[1], [0], [0], [1], [0, 0, 1, 1], [], []>} : vector<8x128xbf16>, vector<128x128xbf16>, vector<8x128xf32> -> vector<8x128xf32>
    %203 = arith.addf %196, %202 : vector<8x128xf32>
    %204 = vector.extract_strided_slice %190 {offsets = [2, 0], sizes = [1, 128], strides = [1, 1]} : vector<5x128xbf16> to vector<1x128xbf16>
    %205 = vector.shape_cast %204 : vector<1x128xbf16> to vector<1x128xbf16>
    %206 = vector.broadcast %205 : vector<1x128xbf16> to vector<8x128xbf16>
    %c2_147 = arith.constant 2 : index
    %c0_148 = arith.constant 0 : index
    %c0_149 = arith.constant 0 : index
    %207 = vector.load %arg6[%c2_147, %c0_148, %c0_149] : memref<5x128x128xbf16, #tpu.memory_space<vmem>>, vector<1x128x128xbf16>
    %208 = vector.shape_cast %207 : vector<1x128x128xbf16> to vector<128x128xbf16>
    %cst_150 = arith.constant dense<0.000000e+00> : vector<8x128xf32>
    %209 = tpu.matmul %206, %208, %cst_150 {dimension_numbers = #tpu.dot_dimension_numbers<[1], [0], [0], [1], [0, 0, 1, 1], [], []>} : vector<8x128xbf16>, vector<128x128xbf16>, vector<8x128xf32> -> vector<8x128xf32>
    %210 = arith.addf %203, %209 : vector<8x128xf32>
    %211 = vector.extract_strided_slice %190 {offsets = [3, 0], sizes = [1, 128], strides = [1, 1]} : vector<5x128xbf16> to vector<1x128xbf16>
    %212 = vector.shape_cast %211 : vector<1x128xbf16> to vector<1x128xbf16>
    %213 = vector.broadcast %212 : vector<1x128xbf16> to vector<8x128xbf16>
    %c3_151 = arith.constant 3 : index
    %c0_152 = arith.constant 0 : index
    %c0_153 = arith.constant 0 : index
    %214 = vector.load %arg6[%c3_151, %c0_152, %c0_153] : memref<5x128x128xbf16, #tpu.memory_space<vmem>>, vector<1x128x128xbf16>
    %215 = vector.shape_cast %214 : vector<1x128x128xbf16> to vector<128x128xbf16>
    %cst_154 = arith.constant dense<0.000000e+00> : vector<8x128xf32>
    %216 = tpu.matmul %213, %215, %cst_154 {dimension_numbers = #tpu.dot_dimension_numbers<[1], [0], [0], [1], [0, 0, 1, 1], [], []>} : vector<8x128xbf16>, vector<128x128xbf16>, vector<8x128xf32> -> vector<8x128xf32>
    %217 = arith.addf %210, %216 : vector<8x128xf32>
    %218 = vector.extract_strided_slice %190 {offsets = [4, 0], sizes = [1, 128], strides = [1, 1]} : vector<5x128xbf16> to vector<1x128xbf16>
    %219 = vector.shape_cast %218 : vector<1x128xbf16> to vector<1x128xbf16>
    %220 = vector.broadcast %219 : vector<1x128xbf16> to vector<8x128xbf16>
    %c4_155 = arith.constant 4 : index
    %c0_156 = arith.constant 0 : index
    %c0_157 = arith.constant 0 : index
    %221 = vector.load %arg6[%c4_155, %c0_156, %c0_157] : memref<5x128x128xbf16, #tpu.memory_space<vmem>>, vector<1x128x128xbf16>
    %222 = vector.shape_cast %221 : vector<1x128x128xbf16> to vector<128x128xbf16>
    %cst_158 = arith.constant dense<0.000000e+00> : vector<8x128xf32>
    %223 = tpu.matmul %220, %222, %cst_158 {dimension_numbers = #tpu.dot_dimension_numbers<[1], [0], [0], [1], [0, 0, 1, 1], [], []>} : vector<8x128xbf16>, vector<128x128xbf16>, vector<8x128xf32> -> vector<8x128xf32>
    %224 = arith.addf %217, %223 : vector<8x128xf32>
    %c0_159 = arith.constant 0 : index
    %c0_160 = arith.constant 0 : index
    %225 = vector.load %arg7[%c0_159, %c0_160] : memref<1x128xf32, #tpu.memory_space<vmem>>, vector<1x128xf32>
    %226 = vector.broadcast %225 : vector<1x128xf32> to vector<8x128xf32>
    %227 = arith.addf %224, %226 : vector<8x128xf32>
    %cst_161 = arith.constant 0.000000e+00 : f32
    %228 = vector.broadcast %cst_161 : f32 to vector<8x128xf32>
    %229 = arith.maximumf %227, %228 : vector<8x128xf32>
    %230 = arith.truncf %229 : vector<8x128xf32> to vector<8x128xbf16>
    %c0_162 = arith.constant 0 : index
    %c0_163 = arith.constant 0 : index
    %231 = vector.load %arg8[%c0_162, %c0_163] : memref<128x128xbf16, #tpu.memory_space<vmem>>, vector<128x128xbf16>
    %cst_164 = arith.constant dense<0.000000e+00> : vector<8x128xf32>
    %232 = tpu.matmul %230, %231, %cst_164 {dimension_numbers = #tpu.dot_dimension_numbers<[1], [0], [0], [1], [0, 0, 1, 1], [], []>} : vector<8x128xbf16>, vector<128x128xbf16>, vector<8x128xf32> -> vector<8x128xf32>
    %c0_165 = arith.constant 0 : index
    %c0_166 = arith.constant 0 : index
    %233 = vector.load %arg9[%c0_165, %c0_166] : memref<1x128xf32, #tpu.memory_space<vmem>>, vector<1x128xf32>
    %234 = vector.broadcast %233 : vector<1x128xf32> to vector<8x128xf32>
    %235 = arith.addf %232, %234 : vector<8x128xf32>
    %cst_167 = arith.constant 0.000000e+00 : f32
    %236 = vector.broadcast %cst_167 : f32 to vector<8x128xf32>
    %237 = arith.maximumf %235, %236 : vector<8x128xf32>
    %238 = arith.truncf %237 : vector<8x128xf32> to vector<8x128xbf16>
    %c0_168 = arith.constant 0 : index
    %c0_169 = arith.constant 0 : index
    %239 = vector.load %arg10[%c0_168, %c0_169] : memref<128x128xbf16, #tpu.memory_space<vmem>>, vector<128x128xbf16>
    %cst_170 = arith.constant dense<0.000000e+00> : vector<8x128xf32>
    %240 = tpu.matmul %238, %239, %cst_170 {dimension_numbers = #tpu.dot_dimension_numbers<[1], [0], [0], [1], [0, 0, 1, 1], [], []>} : vector<8x128xbf16>, vector<128x128xbf16>, vector<8x128xf32> -> vector<8x128xf32>
    %c0_171 = arith.constant 0 : index
    %c0_172 = arith.constant 0 : index
    %241 = vector.load %arg11[%c0_171, %c0_172] : memref<1x128xf32, #tpu.memory_space<vmem>>, vector<1x128xf32>
    %242 = vector.broadcast %241 : vector<1x128xf32> to vector<8x128xf32>
    %243 = arith.addf %240, %242 : vector<8x128xf32>
    %c0_173 = arith.constant 0 : index
    %c0_174 = arith.constant 0 : index
    %c0_175 = arith.constant 0 : index
    %244 = vector.load %arg12[%c0_173, %c0_174, %c0_175] : memref<1x8x128xf32, #tpu.memory_space<vmem>>, vector<1x8x128xf32>
    %245 = vector.shape_cast %244 : vector<1x8x128xf32> to vector<8x128xf32>
    %246 = vector.shape_cast %243 : vector<8x128xf32> to vector<1x8x128xf32>
    tpu.vector_store %arg12[%c0_173, %c0_174, %c0_175], %246 {strides = array<i32>} : memref<1x8x128xf32, #tpu.memory_space<vmem>>, vector<1x8x128xf32>,
    return
  }
  func.func @transform_0(%arg0: i32) -> (i32, i32, i32, i32) {
    %c0_i32 = arith.constant 0 : i32
    %c0_i32_0 = arith.constant 0 : i32
    %c0_i32_1 = arith.constant 0 : i32
    %c0_i32_2 = arith.constant 0 : i32
    return %arg0, %c0_i32, %c0_i32_0, %c0_i32_1 : i32, i32, i32, i32
  }
  func.func @transform_1(%arg0: i32) -> (i32, i32, i32) {
    %c0_i32 = arith.constant 0 : i32
    %c0_i32_0 = arith.constant 0 : i32
    %c0_i32_1 = arith.constant 0 : i32
    %c0_i32_2 = arith.constant 0 : i32
    return %c0_i32, %c0_i32_0, %c0_i32_1 : i32, i32, i32
  }
  func.func @transform_2(%arg0: i32) -> (i32, i32) {
    %c0_i32 = arith.constant 0 : i32
    %c0_i32_0 = arith.constant 0 : i32
    %c0_i32_1 = arith.constant 0 : i32
    return %c0_i32, %c0_i32_0 : i32, i32
  }
  func.func @transform_3(%arg0: i32) -> (i32, i32, i32) {
    %c0_i32 = arith.constant 0 : i32
    %c0_i32_0 = arith.constant 0 : i32
    %c0_i32_1 = arith.constant 0 : i32
    %c0_i32_2 = arith.constant 0 : i32
    return %c0_i32, %c0_i32_0, %c0_i32_1 : i32, i32, i32
  }
  func.func @transform_4(%arg0: i32) -> (i32, i32) {
    %c0_i32 = arith.constant 0 : i32
    %c0_i32_0 = arith.constant 0 : i32
    %c0_i32_1 = arith.constant 0 : i32
    return %c0_i32, %c0_i32_0 : i32, i32
  }
  func.func @transform_5(%arg0: i32) -> (i32, i32, i32) {
    %c0_i32 = arith.constant 0 : i32
    %c0_i32_0 = arith.constant 0 : i32
    %c0_i32_1 = arith.constant 0 : i32
    %c0_i32_2 = arith.constant 0 : i32
    return %c0_i32, %c0_i32_0, %c0_i32_1 : i32, i32, i32
  }
  func.func @transform_6(%arg0: i32) -> (i32, i32) {
    %c0_i32 = arith.constant 0 : i32
    %c0_i32_0 = arith.constant 0 : i32
    %c0_i32_1 = arith.constant 0 : i32
    return %c0_i32, %c0_i32_0 : i32, i32
  }
  func.func @transform_7(%arg0: i32) -> (i32, i32) {
    %c0_i32 = arith.constant 0 : i32
    %c0_i32_0 = arith.constant 0 : i32
    %c0_i32_1 = arith.constant 0 : i32
    return %c0_i32, %c0_i32_0 : i32, i32
  }
  func.func @transform_8(%arg0: i32) -> (i32, i32) {
    %c0_i32 = arith.constant 0 : i32
    %c0_i32_0 = arith.constant 0 : i32
    %c0_i32_1 = arith.constant 0 : i32
    return %c0_i32, %c0_i32_0 : i32, i32
  }
  func.func @transform_9(%arg0: i32) -> (i32, i32) {
    %c0_i32 = arith.constant 0 : i32
    %c0_i32_0 = arith.constant 0 : i32
    %c0_i32_1 = arith.constant 0 : i32
    return %c0_i32, %c0_i32_0 : i32, i32
  }
  func.func @transform_10(%arg0: i32) -> (i32, i32) {
    %c0_i32 = arith.constant 0 : i32
    %c0_i32_0 = arith.constant 0 : i32
    %c0_i32_1 = arith.constant 0 : i32
    return %c0_i32, %c0_i32_0 : i32, i32
  }
  func.func @transform_11(%arg0: i32) -> (i32, i32, i32) {
    %c0_i32 = arith.constant 0 : i32
    %c0_i32_0 = arith.constant 0 : i32
    %c0_i32_1 = arith.constant 0 : i32
    return %arg0, %c0_i32, %c0_i32_0 : i32, i32, i32
  }
}

</mosaic_0001>

<bundles_post_ra>
// kernel: net_forward.1
= control target key start
LH: loop header
LB: loop body
LE: loop exit
PB: predicated region body
PF: predicated region fallthrough
CT: control target
= control target key end

     0   :  { %16 = vsyncpa [#allocation3], 0  ;;  %s5752_s0 = inlined_call_operand.vmem [shape: bf16[2,4,8,128], index: 0, kind: input, shape index: {}]   ;;  %s5753_s1 = inlined_call_operand.vmem [shape: bf16[5,128,256], index: 1, kind: input, shape index: {}]   ;;  %s5754_s2 = inlined_call_operand.vmem [shape: f32[1,128], index: 2, kind: input, shape index: {}]   ;;  %s5755_s3 = inlined_call_operand.hbm [shape: bf16[5,128,256], index: 3, kind: input, shape index: {}]   ;;  %s5756_s4 = inlined_call_operand.vmem [shape: f32[1,128], index: 4, kind: input, shape index: {}]   ;;  %s5757_s5 = inlined_call_operand.hbm [shape: bf16[5,128,128], index: 5, kind: input, shape index: {}]   ;;  %s5758_s6 = inlined_call_operand.vmem [shape: f32[1,128], index: 6, kind: input, shape index: {}]   ;;  %s5759_s7 = inlined_call_operand.vmem [shape: bf16[128,128], index: 7, kind: input, shape index: {}]   ;;  %s5760_s8 = inlined_call_operand.vmem [shape: f32[1,128], index: 8, kind: input, shape index: {}]   ;;  %s5761_s9 = inlined_call_operand.vmem [shape: bf16[128,128], index: 9, kind: input, shape index: {}]   ;;  %s5762_s10 = inlined_call_operand.vmem [shape: f32[1,128], index: 10, kind: input, shape index: {}]   ;;  %s5763_s11 = inlined_call_operand.vmem [shape: f32[2,8,128], index: 11, kind: output, shape index: {}]  }
   0x1   :  { %17 = vsyncpa [#allocation5], 0  ;;  %s4714_s17 = smov 0  }
   0x2 LB: > { %s4645_s18 = smov [#allocation2]   ;;  %s4720_s20 = sadd.s32 4294967295, %s4643_s17   ;;  %s4643_s17 = sphi %s4714_s17, %s23_s17  }
   0x3   : > { %s308_s19 = sshll.u32 %s4645_s18, 4  ;;  %p3620_p0 = scmp.ge.s32.totalorder %s4643_s17, 1  ;;  %s309_s19 = int_to_ptr.vmem [resolvable:$true] %s308_s19 }
   0x4   : > { %p290_p1 = scmp.lt.s32.totalorder %s4643_s17, 3  ;;  %p5764_p3 = scmp.eq.s32.totalorder %s4720_s20, 0 }
   0x5   : > { %s4646_s22 = smov [#allocation4]   ;;  %s4573_s27 = scalar_lea.hbm %s5755_s3, 10240 }
   0x6   : > { %p4724_p2 = pnand %p3620_p0, %p290_p1  ;;  %s324_s23 = sshll.u32 %s4646_s22, 4  ;;  %s4737_s23 = int_to_ptr.vmem [resolvable:$true] %s324_s23 }
   0x7   : > { %p4574_p6 = scmp.ne.s32.totalorder %s5755_s3, %s4573_s27  ;;  %p4580_p10 = scmp.lt.u32.totalorder %s4573_s27, %s5755_s3 }
   0x8   : > { %s5792_s21 = scalar_select %p4724_p2, 1, 0 }
   0x9   : > { %p4232_p4 = pneg %p4724_p2 }
   0xb   : > { %p4733_p5 = pnand %p5764_p3, %p4232_p4 }
   0xd   : > { %p4575_p7 = pneg %p4733_p5 }
   0xf   : > { %p4576_p8 = pnand %p4575_p7, %p4574_p6 }
  0x11   : > { %p4577_p9 = pneg %p4576_p8 }
  0x13   : > { %p4582_p11 = pnand %p4580_p10, %p4577_p9 }
  0x15   : > { %4585 = shalt.err (!%p4582_p11)
}
  0x16   : > { %s4586_s13 = scalar_lea.vmem %s309_s19, 10240  ;;  %p4594_p1 = scmp.lt.s32.totalorder %s309_s19, %s309_s19 }
  0x17   : > { %p4587_p12 = scmp.ne.s32.totalorder %s309_s19, %s4586_s13  ;;  %p4595_p4 = scmp.lt.s32.totalorder %s4586_s13, %s4586_s13 }
  0x19   : > { %p4589_p13 = pnand %p4587_p12, %p4575_p7  ;;  %p4596_p3 = por %p4595_p4, %p4594_p1 }
  0x1b   : > { %p4590_p0 = pneg %p4589_p13 }
  0x1d   : > { %p4597_p2 = pnand %p4596_p3, %p4590_p0 }
  0x1f   : > { %4600 = shalt.err (!%p4597_p2)
}
  0x20   : > { %s4647_s14 = smov 128   ;;  %s4648_s15 = smov 8  }
  0x21   : > { %4235 = dma.hbm_to_vmem [thread:$0]  (!%p4733_p5), %s5755_s3, 10240, %s309_s19, [#allocation3], %s4647_s14, %s4647_s14, %s4648_s15  }
  0x22   : > { %s4601_s26 = scalar_lea.hbm %s5757_s5, 5120 }
  0x23   : > { %p4602_p6 = scmp.ne.s32.totalorder %s5757_s5, %s4601_s26  ;;  %p4608_p8 = scmp.lt.u32.totalorder %s4601_s26, %s5757_s5 }
  0x25   : > { %p4604_p2 = pnand %p4602_p6, %p4575_p7 }
  0x27   : > { %p4605_p3 = pneg %p4604_p2 }
  0x29   : > { %p4610_p9 = pnand %p4608_p8, %p4605_p3 }
  0x2b   : > { %4613 = shalt.err (!%p4610_p9)
}
  0x2c   : > { %s4614_s19 = scalar_lea.vmem %s4737_s23, 5120  ;;  %p4622_p13 = scmp.lt.s32.totalorder %s4737_s23, %s4737_s23 }
  0x2d   : > { %p4615_p10 = scmp.ne.s32.totalorder %s4737_s23, %s4614_s19  ;;  %p4623_p0 = scmp.lt.s32.totalorder %s4614_s19, %s4614_s19 }
  0x2f   : > { %p4617_p11 = pnand %p4615_p10, %p4575_p7  ;;  %p4624_p1 = por %p4623_p0, %p4622_p13 }
  0x31   : > { %p4618_p12 = pneg %p4617_p11 }
  0x33   : > { %p4625_p4 = pnand %p4624_p1, %p4618_p12 }
  0x35   : > { %4628 = shalt.err (!%p4625_p4)
}
  0x36   : > { %s4649_s12 = smov 64   ;;  %s4650_s13 = smov 4  }
  0x37   : > { %4238 = dma.hbm_to_vmem [thread:$0]  (!%p4733_p5), %s5757_s5, 5120, %s4737_s23, [#allocation5], %s4649_s12, %s4649_s12, %s4650_s13  }
  0x38   : > { %p5794_p6 = scmp.ne.s32.totalorder %s5792_s21, 0 }
  0x3a   : > { %363 = sbr.rel (%p5794_p6) target bundleno = 1691 (0x69b), region = 64 }
  0x41   : > { %p5795_p7 = scmp.eq.s32.totalorder %s4720_s20, 0 }
  0x43   : > { %4634 = dma.done.wait (%p5795_p7), [#allocation3], 10240   ;;  %p5796_p2 = pmov %p5795_p7 }
  0x45   : > { %4636 = vsyncadd (%p5796_p2), [#allocation3], 4294957056  ;;  %p5797_p3 = pmov %p5796_p2 }
  0x46   : > { %p5798_p8 = pmov %p5796_p2 }
  0x47   : > { %4638 = dma.done.wait (%p5797_p3), [#allocation5], 5120  }
  0x48   : > { %4640 = vsyncadd (%p5798_p8), [#allocation5], 4294962176  ;;  %v5766_v0 = vmov 0   ;;  %v4260_v1 = vld [vmem:[%s5753_s1 + $0x84] ss:$8 sps:$4 sm:$0xff]   ;;  %p406_p5 = scmp.lt.s32.totalorder %s4720_s20, 1 }
  0x49   : > { %568 = vmatprep.mubr.bf16.mxu0 %v5766_v0  ;;  %1162 = vmatprep.mubr.bf16.mxu1 %v5766_v0  ;;  %v4262_v2 = vld [vmem:[%s5753_s1 + $0x80] ss:$8 sps:$4 sm:$0xff]   ;;  %v4263_v3 = vld [vmem:[%s5753_s1 + $0x94] ss:$8 sps:$4 sm:$0xff]   ;;  %v4265_v4 = vld [vmem:[%s5753_s1 + $0x90] ss:$8 sps:$4 sm:$0xff]  }
  0x4a   : > { %536 = vmatprep.subr.bf16.mxu0 %v4260_v1  ;;  %1130 = vmatprep.subr.bf16.mxu1 %v4260_v1  ;;  %v4266_v5 = vld [vmem:[%s5753_s1 + $0xa4] ss:$8 sps:$4 sm:$0xff]   ;;  %v4268_v6 = vld [vmem:[%s5753_s1 + $0xa0] ss:$8 sps:$4 sm:$0xff]   ;;  %v4269_v7 = vld [vmem:[%s5753_s1 + $0xb4] ss:$8 sps:$4 sm:$0xff]  }
  0x4b   : > { %537 = vmatpush1.bf16.msra.mxu0 %v4262_v2  ;;  %1131 = vmatpush1.bf16.msra.mxu1 %v4262_v2  ;;  %v4271_v8 = vld [vmem:[%s5753_s1 + $0xb0] ss:$8 sps:$4 sm:$0xff]   ;;  %v4272_v9 = vld [vmem:[%s5753_s1 + $0xc4] ss:$8 sps:$4 sm:$0xff]   ;;  %v4274_v10 = vld [vmem:[%s5753_s1 + $0xc0] ss:$8 sps:$4 sm:$0xff]  }
  0x4c   : > { %538 = vmatprep.subr.bf16.mxu0 %v4263_v3  ;;  %1132 = vmatprep.subr.bf16.mxu1 %v4263_v3  ;;  %v4275_v11 = vld [vmem:[%s5753_s1 + $0xd4] ss:$8 sps:$4 sm:$0xff]   ;;  %v4277_v12 = vld [vmem:[%s5753_s1 + $0xd0] ss:$8 sps:$4 sm:$0xff]   ;;  %v4838_v13 = vld [vmem:[%s5753_s1 + $0xe4] ss:$8 sps:$4 sm:$0xff]  }
  0x4d   : > { %s5825_s20 = smov (!%p406_p5, %s4720_s20), 1  ;;  %v4846_v14 = vld [vmem:[%s5753_s1 + $0xe0] ss:$8 sps:$4 sm:$0xff]   ;;  %v4853_v15 = vld [vmem:[%s5753_s1 + $0xf4] ss:$8 sps:$4 sm:$0xff]   ;;  %vm4653_vm0 = vmmov 0  }
  0x4e   : > { %s3924_s12 = sshll.u32 %s5825_s20, 4  ;;  %v4861_v16 = vld [vmem:[%s5753_s1 + $0xf0] ss:$8 sps:$4 sm:$0xff]   ;;  %v4873_v17 = vld [vmem:[%s5753_s1 + $0x4] ss:$8 sps:$4 sm:$0xff]   ;;  %s3629_s14 = sshll.u32 %s5825_s20, 3 }
  0x4f   : > { %539 = vmatpush1.bf16.msra.mxu0 %v4265_v4  ;;  %1133 = vmatpush1.bf16.msra.mxu1 %v4265_v4  ;;  %s4866_s21 = scalar_lea.vmem %s5752_s0, %s3924_s12  ;;  %v4883_v19 = vld [vmem:[%s5753_s1] ss:$8 sps:$4 sm:$0xff]   ;;  %v4893_v21 = vld [vmem:[%s5753_s1 + $0x14] ss:$8 sps:$4 sm:$0xff]   ;;  %v4902_v22 = vld [vmem:[%s5753_s1 + $0x10] ss:$8 sps:$4 sm:$0xff]   ;;  %s414_s18 = scalar_lea.vmem %s5763_s11, %s3629_s14 }
  0x50   : > { %540 = vmatprep.subr.bf16.mxu0 %v4266_v5  ;;  %1134 = vmatprep.subr.bf16.mxu1 %v4266_v5  ;;  %v4876_v18 = vld [vmem:[%s4866_s21 + $0x4] sm:$0xf]  ;;  %v4886_v20 = vld [vmem:[%s4866_s21 + $0x8] sm:$0xf]  ;;  %v4925_v25 = vld [vmem:[%s5753_s1 + $0x34] ss:$8 sps:$4 sm:$0xff]  }
  0x51   : > { %v4909_v23 = vld [vmem:[%s5753_s1 + $0x24] ss:$8 sps:$4 sm:$0xff]   ;;  %v4918_v24 = vld [vmem:[%s5753_s1 + $0x20] ss:$8 sps:$4 sm:$0xff]   ;;  %v4932_v26 = vld [vmem:[%s5753_s1 + $0x30] ss:$8 sps:$4 sm:$0xff]  }
  0x52   : > { %v4939_v27 = vld [vmem:[%s5753_s1 + $0x44] ss:$8 sps:$4 sm:$0xff]   ;;  %v4946_v28 = vld [vmem:[%s5753_s1 + $0x40] ss:$8 sps:$4 sm:$0xff]   ;;  %v4953_v29 = vld [vmem:[%s5753_s1 + $0x54] ss:$8 sps:$4 sm:$0xff]  }
  0x53   : > { %541 = vmatpush1.bf16.msra.mxu0 %v4268_v6  ;;  %1135 = vmatpush1.bf16.msra.mxu1 %v4268_v6  ;;  %v4960_v30 = vld [vmem:[%s5753_s1 + $0x50] ss:$8 sps:$4 sm:$0xff]   ;;  %v4967_v31 = vld [vmem:[%s5753_s1 + $0x64] ss:$8 sps:$4 sm:$0xff]   ;;  %v4972_v32 = vld [vmem:[%s5753_s1 + $0x60] ss:$8 sps:$4 sm:$0xff]  }
  0x54   : > { %542 = vmatprep.subr.bf16.mxu0 %v4269_v7  ;;  %1136 = vmatprep.subr.bf16.mxu1 %v4269_v7  ;;  %v4977_v33 = vld [vmem:[%s5753_s1 + $0x74] ss:$8 sps:$4 sm:$0xff]   ;;  %v4986_v34 = vld [vmem:[%s5753_s1 + $0x70] ss:$8 sps:$4 sm:$0xff]   ;;  %v4991_v35 = vld [vmem:[%s5753_s1 + $0x104] ss:$8 sps:$4 sm:$0xff]  }
  0x55   : > { %v4998_v36 = vld [vmem:[%s4866_s21] sm:$0xf]  ;;  %v5008_v38 = vld [vmem:[%s5753_s1 + $0x114] ss:$8 sps:$4 sm:$0xff]   ;;  %v5017_v39 = vld [vmem:[%s5753_s1 + $0x110] ss:$8 sps:$4 sm:$0xff]  }
  0x56   : > { %v5003_v37 = vld [vmem:[%s5753_s1 + $0x100] ss:$8 sps:$4 sm:$0xff]   ;;  %v5024_v40 = vld [vmem:[%s5753_s1 + $0x124] ss:$8 sps:$4 sm:$0xff]   ;;  %v5040_v42 = vld [vmem:[%s5753_s1 + $0x134] ss:$8 sps:$4 sm:$0xff]   ;;  %v3761_v2 = vcombine.low %v4998_v36, %v4998_v36 }
  0x57   : > { %543 = vmatpush1.bf16.msra.mxu0 %v4271_v8  ;;  %1137 = vmatpush1.bf16.msra.mxu1 %v4271_v8  ;;  %v5033_v41 = vld [vmem:[%s5753_s1 + $0x120] ss:$8 sps:$4 sm:$0xff]   ;;  %v5049_v43 = vld [vmem:[%s5753_s1 + $0x130] ss:$8 sps:$4 sm:$0xff]   ;;  %v5054_v44 = vld [vmem:[%s5753_s1 + $0x144] ss:$8 sps:$4 sm:$0xff]  }
  0x58   : > { %544 = vmatprep.subr.bf16.mxu0 %v4272_v9  ;;  %1138 = vmatprep.subr.bf16.mxu1 %v4272_v9  ;;  %v5063_v45 = vld [vmem:[%s5753_s1 + $0x140] ss:$8 sps:$4 sm:$0xff]   ;;  %v5068_v46 = vld [vmem:[%s5753_s1 + $0x154] ss:$8 sps:$4 sm:$0xff]   ;;  %v5077_v47 = vld [vmem:[%s5753_s1 + $0x150] ss:$8 sps:$4 sm:$0xff]  }
  0x59   : > { %v5082_v48 = vld [vmem:[%s5753_s1 + $0x164] ss:$8 sps:$4 sm:$0xff]   ;;  %v5091_v49 = vld [vmem:[%s5753_s1 + $0x160] ss:$8 sps:$4 sm:$0xff]   ;;  %v5096_v50 = vld [vmem:[%s5753_s1 + $0x174] ss:$8 sps:$4 sm:$0xff]  }
  0x5a   : > { %v5105_v51 = vld [vmem:[%s5753_s1 + $0x170] ss:$8 sps:$4 sm:$0xff]   ;;  %v5110_v52 = vld [vmem:[%s5753_s1 + $0x184] ss:$8 sps:$4 sm:$0xff]   ;;  %v5119_v53 = vld [vmem:[%s5753_s1 + $0x180] ss:$8 sps:$4 sm:$0xff]  }
  0x5b   : > { %545 = vmatpush1.bf16.msra.mxu0 %v4274_v10  ;;  %1139 = vmatpush1.bf16.msra.mxu1 %v4274_v10  ;;  %v5122_v54 = vld [vmem:[%s4866_s21 + $0xc] sm:$0xf]  ;;  %v5127_v55 = vld [vmem:[%s5753_s1 + $0x194] ss:$8 sps:$4 sm:$0xff]   ;;  %v5136_v56 = vld [vmem:[%s5753_s1 + $0x190] ss:$8 sps:$4 sm:$0xff]  }
  0x5c   : > { %546 = vmatprep.subr.bf16.mxu0 %v4275_v11  ;;  %1140 = vmatprep.subr.bf16.mxu1 %v4275_v11  ;;  %v5143_v57 = vld [vmem:[%s5753_s1 + $0x1a4] ss:$8 sps:$4 sm:$0xff]   ;;  %v5152_v58 = vld [vmem:[%s5753_s1 + $0x1a0] ss:$8 sps:$4 sm:$0xff]   ;;  %v5159_v59 = vld [vmem:[%s5753_s1 + $0x1b4] ss:$8 sps:$4 sm:$0xff]  }
  0x5d   : > { %v5168_v60 = vld [vmem:[%s5753_s1 + $0x1b0] ss:$8 sps:$4 sm:$0xff]   ;;  %v5173_v61 = vld [vmem:[%s5753_s1 + $0x1c4] ss:$8 sps:$4 sm:$0xff]   ;;  %v5182_v62 = vld [vmem:[%s5753_s1 + $0x1c0] ss:$8 sps:$4 sm:$0xff]  }
  0x5e   : > { %v5187_v63 = vld [vmem:[%s5753_s1 + $0x1d4] ss:$8 sps:$4 sm:$0xff]   ;;  %v5196_v1 = vld [vmem:[%s5753_s1 + $0x1d0] ss:$8 sps:$4 sm:$0xff]   ;;  %v5203_v3 = vld [vmem:[%s5753_s1 + $0x1e4] ss:$8 sps:$4 sm:$0xff]  }
  0x5f   : > { %547 = vmatpush1.bf16.msra.mxu0 %v4277_v12  ;;  %1141 = vmatpush1.bf16.msra.mxu1 %v4277_v12  ;;  %v1001_v4 = vshll.u32 %v3761_v2, 16  ;;  %v5214_v5 = vld [vmem:[%s5753_s1 + $0x1e0] ss:$8 sps:$4 sm:$0xff]   ;;  %v5221_v6 = vld [vmem:[%s5753_s1 + $0x1f4] ss:$8 sps:$4 sm:$0xff]   ;;  %v999_v7 = vshrl.u32 %v3761_v2, 16 }
  0x60   : > { %548 = vmatprep.subr.bf16.mxu0 %v4838_v13  ;;  %1142 = vmatprep.subr.bf16.mxu1 %v4838_v13  ;;  %v5228_v9 = vld [vmem:[%s5753_s1 + $0x1f0] ss:$8 sps:$4 sm:$0xff]   ;;  %v5235_v10 = vld [vmem:[%s5753_s1 + $0x204] ss:$8 sps:$4 sm:$0xff]   ;;  %v5244_v12 = vld [vmem:[%s5753_s1 + $0x200] ss:$8 sps:$4 sm:$0xff]  }
  0x61   : > { %v1003_v8 = vrot.slane %v1001_v4, 1  ;;  %v5267_v2 = vld [vmem:[%s5753_s1 + $0x224] ss:$8 sps:$4 sm:$0xff]   ;;  %v5276_v4 = vld [vmem:[%s5753_s1 + $0x220] ss:$8 sps:$4 sm:$0xff]  }
  0x62   : > { %5801 = vst [vmem:[#allocation10_spill] sm:$0xff] %v5267_v2  ;;  %5802 = vst [vmem:[#allocation11_spill] sm:$0xff] %v5276_v4 }
  0x63   : > { %549 = vmatpush1.bf16.msra.mxu0 %v4846_v14  ;;  %1143 = vmatpush1.bf16.msra.mxu1 %v4846_v14  ;;  %v5237_v11 = vor.u32 %v1003_v8, %v999_v7  ;;  %v5283_v7 = vld [vmem:[%s5753_s1 + $0x234] ss:$8 sps:$4 sm:$0xff]   ;;  %v5290_v8 = vld [vmem:[%s5753_s1 + $0x230] ss:$8 sps:$4 sm:$0xff]  }
  0x64   : > { %550 = vmatprep.subr.bf16.mxu0 %v4853_v15  ;;  %1144 = vmatprep.subr.bf16.mxu1 %v4853_v15  ;;  %5803 = vst [vmem:[#allocation12_spill] sm:$0xff] %v5283_v7  ;;  %5804 = vst [vmem:[#allocation13_spill] sm:$0xff] %v5290_v8 }
  0x67   : > { %551 = vmatpush1.bf16.msra.mxu0 %v4861_v16  ;;  %1145 = vmatpush1.bf16.msra.mxu1 %v4861_v16 }
  0x68   : > { %657 = vmatprep.subr.bf16.mxu0 %v4873_v17  ;;  %1171 = vmatprep.subr.bf16.mxu1 %v4873_v17 }
  0x6a   : > { %569 = vmatmul.mubr.bf16.vlgmr.msra.gmra.mrb[0].mxu0 %v4876_v18  ;;  %1163 = vmatmul.mubr.bf16.vlgmr.msra.gmra.mrb[0].mxu1 %v4886_v20 }
  0x6b   : > { %658 = vmatpush1.bf16.msra.mxu0 %v4883_v19  ;;  %1172 = vmatpush1.bf16.msra.mxu1 %v4883_v19 }
  0x6c   : > { %659 = vmatprep.subr.bf16.mxu0 %v4893_v21  ;;  %1173 = vmatprep.subr.bf16.mxu1 %v4893_v21 }
  0x6d   : > { %689 = vmatprep.mubr.bf16.mxu0 %v5766_v0  ;;  %1203 = vmatprep.mubr.bf16.mxu1 %v5766_v0 }
  0x6f   : > { %660 = vmatpush1.bf16.msra.mxu0 %v4902_v22  ;;  %1174 = vmatpush1.bf16.msra.mxu1 %v4902_v22 }
  0x70   : > { %661 = vmatprep.subr.bf16.mxu0 %v4909_v23  ;;  %1175 = vmatprep.subr.bf16.mxu1 %v4909_v23 }
  0x73   : > { %662 = vmatpush1.bf16.msra.mxu0 %v4918_v24  ;;  %1176 = vmatpush1.bf16.msra.mxu1 %v4918_v24 }
  0x74   : > { %663 = vmatprep.subr.bf16.mxu0 %v4925_v25  ;;  %1177 = vmatprep.subr.bf16.mxu1 %v4925_v25 }
  0x77   : > { %664 = vmatpush1.bf16.msra.mxu0 %v4932_v26  ;;  %1178 = vmatpush1.bf16.msra.mxu1 %v4932_v26 }
  0x78   : > { %665 = vmatprep.subr.bf16.mxu0 %v4939_v27  ;;  %1179 = vmatprep.subr.bf16.mxu1 %v4939_v27 }
  0x7b   : > { %666 = vmatpush1.bf16.msra.mxu0 %v4946_v28  ;;  %1180 = vmatpush1.bf16.msra.mxu1 %v4946_v28 }
  0x7c   : > { %667 = vmatprep.subr.bf16.mxu0 %v4953_v29  ;;  %1181 = vmatprep.subr.bf16.mxu1 %v4953_v29 }
  0x7f   : > { %668 = vmatpush1.bf16.msra.mxu0 %v4960_v30  ;;  %1182 = vmatpush1.bf16.msra.mxu1 %v4960_v30 }
  0x80   : > { %669 = vmatprep.subr.bf16.mxu0 %v4967_v31  ;;  %1183 = vmatprep.subr.bf16.mxu1 %v4967_v31 }
  0x83   : > { %670 = vmatpush1.bf16.msra.mxu0 %v4972_v32  ;;  %1184 = vmatpush1.bf16.msra.mxu1 %v4972_v32 }
  0x84   : > { %671 = vmatprep.subr.bf16.mxu0 %v4977_v33  ;;  %1185 = vmatprep.subr.bf16.mxu1 %v4977_v33 }
  0x87   : > { %672 = vmatpush1.bf16.msra.mxu0 %v4986_v34  ;;  %1186 = vmatpush1.bf16.msra.mxu1 %v4986_v34 }
  0x88   : > { %795 = vmatprep.subr.bf16.mxu0 %v4991_v35  ;;  %1212 = vmatprep.subr.bf16.mxu1 %v4991_v35 }
  0x8a   : > { %690 = vmatmul.mubr.bf16.vlgmr.msra.gmra.mrb[0].mxu0 %v4998_v36  ;;  %1204 = vmatmul.mubr.bf16.vlgmr.msra.gmra.mrb[0].mxu1 %v4876_v18  ;;  %v5260_v36 = vld [vmem:[%s5753_s1 + $0x210] ss:$8 sps:$4 sm:$0xff]  }
  0x8b   : > { %796 = vmatpush1.bf16.msra.mxu0 %v5003_v37  ;;  %1213 = vmatpush1.bf16.msra.mxu1 %v5003_v37  ;;  %5800 = vst [vmem:[#allocation9_spill] sm:$0xff] %v5260_v36 }
  0x8c   : > { %797 = vmatprep.subr.bf16.mxu0 %v5008_v38  ;;  %1214 = vmatprep.subr.bf16.mxu1 %v5008_v38 }
  0x8d   : > { %827 = vmatprep.mubr.bf16.mxu0 %v5766_v0  ;;  %1244 = vmatprep.mubr.bf16.mxu1 %v5766_v0 }
  0x8f   : > { %798 = vmatpush1.bf16.msra.mxu0 %v5017_v39  ;;  %1215 = vmatpush1.bf16.msra.mxu1 %v5017_v39 }
  0x90   : > { %799 = vmatprep.subr.bf16.mxu0 %v5024_v40  ;;  %1216 = vmatprep.subr.bf16.mxu1 %v5024_v40 }
  0x93   : > { %800 = vmatpush1.bf16.msra.mxu0 %v5033_v41  ;;  %1217 = vmatpush1.bf16.msra.mxu1 %v5033_v41 }
  0x94   : > { %801 = vmatprep.subr.bf16.mxu0 %v5040_v42  ;;  %1218 = vmatprep.subr.bf16.mxu1 %v5040_v42 }
  0x97   : > { %802 = vmatpush1.bf16.msra.mxu0 %v5049_v43  ;;  %1219 = vmatpush1.bf16.msra.mxu1 %v5049_v43 }
  0x98   : > { %803 = vmatprep.subr.bf16.mxu0 %v5054_v44  ;;  %1220 = vmatprep.subr.bf16.mxu1 %v5054_v44 }
  0x9b   : > { %804 = vmatpush1.bf16.msra.mxu0 %v5063_v45  ;;  %1221 = vmatpush1.bf16.msra.mxu1 %v5063_v45 }
  0x9c   : > { %805 = vmatprep.subr.bf16.mxu0 %v5068_v46  ;;  %1222 = vmatprep.subr.bf16.mxu1 %v5068_v46 }
  0x9f   : > { %806 = vmatpush1.bf16.msra.mxu0 %v5077_v47  ;;  %1223 = vmatpush1.bf16.msra.mxu1 %v5077_v47 }
  0xa0   : > { %807 = vmatprep.subr.bf16.mxu0 %v5082_v48  ;;  %1224 = vmatprep.subr.bf16.mxu1 %v5082_v48 }
  0xa3   : > { %808 = vmatpush1.bf16.msra.mxu0 %v5091_v49  ;;  %1225 = vmatpush1.bf16.msra.mxu1 %v5091_v49 }
  0xa4   : > { %809 = vmatprep.subr.bf16.mxu0 %v5096_v50  ;;  %1226 = vmatprep.subr.bf16.mxu1 %v5096_v50 }
  0xa7   : > { %810 = vmatpush1.bf16.msra.mxu0 %v5105_v51  ;;  %1227 = vmatpush1.bf16.msra.mxu1 %v5105_v51 }
  0xa8   : > { %935 = vmatprep.subr.bf16.mxu0 %v5110_v52  ;;  %1255 = vmatprep.subr.bf16.mxu1 %v5110_v52 }
  0xaa   : > { %828 = vmatmul.mubr.bf16.vlgmr.msra.gmra.mrb[0].mxu0 %v4886_v20  ;;  %1245 = vmatmul.mubr.bf16.vlgmr.msra.gmra.mrb[0].mxu1 %v5122_v54  ;;  %v5251_v20 = vld [vmem:[%s5753_s1 + $0x214] ss:$8 sps:$4 sm:$0xff]  }
  0xab   : > { %936 = vmatpush1.bf16.msra.mxu0 %v5119_v53  ;;  %1256 = vmatpush1.bf16.msra.mxu1 %v5119_v53  ;;  %5799 = vst [vmem:[#allocation8_spill] sm:$0xff] %v5251_v20 }
  0xac   : > { %937 = vmatprep.subr.bf16.mxu0 %v5127_v55  ;;  %1257 = vmatprep.subr.bf16.mxu1 %v5127_v55 }
  0xad   : > { %967 = vmatprep.mubr.bf16.mxu0 %v5766_v0  ;;  %1287 = vmatprep.mubr.bf16.mxu1 %v5766_v0 }
  0xaf   : > { %938 = vmatpush1.bf16.msra.mxu0 %v5136_v56  ;;  %1258 = vmatpush1.bf16.msra.mxu1 %v5136_v56 }
  0xb0   : > { %939 = vmatprep.subr.bf16.mxu0 %v5143_v57  ;;  %1259 = vmatprep.subr.bf16.mxu1 %v5143_v57 }
  0xb3   : > { %940 = vmatpush1.bf16.msra.mxu0 %v5152_v58  ;;  %1260 = vmatpush1.bf16.msra.mxu1 %v5152_v58 }
  0xb4   : > { %941 = vmatprep.subr.bf16.mxu0 %v5159_v59  ;;  %1261 = vmatprep.subr.bf16.mxu1 %v5159_v59 }
  0xb7   : > { %942 = vmatpush1.bf16.msra.mxu0 %v5168_v60  ;;  %1262 = vmatpush1.bf16.msra.mxu1 %v5168_v60 }
  0xb8   : > { %943 = vmatprep.subr.bf16.mxu0 %v5173_v61  ;;  %1263 = vmatprep.subr.bf16.mxu1 %v5173_v61 }
  0xbb   : > { %944 = vmatpush1.bf16.msra.mxu0 %v5182_v62  ;;  %1264 = vmatpush1.bf16.msra.mxu1 %v5182_v62 }
  0xbc   : > { %945 = vmatprep.subr.bf16.mxu0 %v5187_v63  ;;  %1265 = vmatprep.subr.bf16.mxu1 %v5187_v63 }
  0xbf   : > { %946 = vmatpush1.bf16.msra.mxu0 %v5196_v1  ;;  %1266 = vmatpush1.bf16.msra.mxu1 %v5196_v1 }
  0xc0   : > { %947 = vmatprep.subr.bf16.mxu0 %v5203_v3  ;;  %1267 = vmatprep.subr.bf16.mxu1 %v5203_v3 }
  0xc3   : > { %948 = vmatpush1.bf16.msra.mxu0 %v5214_v5  ;;  %1268 = vmatpush1.bf16.msra.mxu1 %v5214_v5 }
  0xc4   : > { %949 = vmatprep.subr.bf16.mxu0 %v5221_v6  ;;  %1269 = vmatprep.subr.bf16.mxu1 %v5221_v6 }
  0xc7   : > { %950 = vmatpush1.bf16.msra.mxu0 %v5228_v9  ;;  %1270 = vmatpush1.bf16.msra.mxu1 %v5228_v9 }
  0xc8   : > { %1086 = vmatprep.subr.bf16.mxu0 %v5235_v10  ;;  %1309 = vmatprep.subr.bf16.mxu1 %v5235_v10 }
  0xca   : > { %968 = vmatmul.mubr.bf16.vlgmr.msra.gmra.mrb[0].mxu0 %v5122_v54  ;;  %1288 = vmatmul.mubr.bf16.vlgmr.msra.gmra.mrb[0].mxu1 %v5237_v11 }
  0xcb   : > { %1087 = vmatpush1.bf16.msra.mxu0 %v5244_v12  ;;  %1310 = vmatpush1.bf16.msra.mxu1 %v5244_v12 }
  0xcc   : > { %1088 = vmatprep.subr.bf16.mxu0 %v5251_v20  ;;  %1311 = vmatprep.subr.bf16.mxu1 %v5251_v20 }
  0xcd   : > { %1118 = vmatprep.mubr.bf16.mxu0 %v5766_v0  ;;  %1341 = vmatprep.mubr.bf16.mxu1 %v5766_v0  ;;  %v5297_v0 = vld [vmem:[%s5753_s1 + $0x244] ss:$8 sps:$4 sm:$0xff]  }
  0xce   : > { %5805 = vst [vmem:[#allocation14_spill] sm:$0xff] %v5297_v0 }
  0xcf   : > { %1089 = vmatpush1.bf16.msra.mxu0 %v5260_v36  ;;  %1312 = vmatpush1.bf16.msra.mxu1 %v5260_v36 }
  0xd0   : > { %1090 = vmatprep.subr.bf16.mxu0 %v5267_v2  ;;  %1313 = vmatprep.subr.bf16.mxu1 %v5267_v2  ;;  %v3778_v2 = vcombine.low %v4876_v18, %v4876_v18  ;;  %v5334_v18 = vld [vmem:[%s5753_s1 + $0x260] ss:$8 sps:$4 sm:$0xff]  }
  0xd2   : > { %v1304_v36 = vshll.u32 %v3778_v2, 16 }
  0xd3   : > { %1091 = vmatpush1.bf16.msra.mxu0 %v5276_v4  ;;  %1314 = vmatpush1.bf16.msra.mxu1 %v5276_v4  ;;  %v5304_v4 = vld [vmem:[%s5753_s1 + $0x240] ss:$8 sps:$4 sm:$0xff]  }
  0xd4   : > { %1092 = vmatprep.subr.bf16.mxu0 %v5283_v7  ;;  %1315 = vmatprep.subr.bf16.mxu1 %v5283_v7  ;;  %5806 = vst [vmem:[#allocation15_spill] sm:$0xff] %v5304_v4  ;;  %v5311_v7 = vld [vmem:[%s5753_s1 + $0x254] ss:$8 sps:$4 sm:$0xff]   ;;  %v1306_v20 = vrot.slane %v1304_v36, 1  ;;  %v4560_v36 = vld [vmem:[%s5753_s1 + $0x84] ss:$8 sps:$4 sm:$0xff]  }
  0xd5   : > { %5807 = vst [vmem:[#allocation16_spill] sm:$0xff] %v5311_v7 }
  0xd7   : > { %1093 = vmatpush1.bf16.msra.mxu0 %v5290_v8  ;;  %1316 = vmatpush1.bf16.msra.mxu1 %v5290_v8  ;;  %v5320_v8 = vld [vmem:[%s5753_s1 + $0x250] ss:$8 sps:$4 sm:$0xff]  }
  0xd8   : > { %1094 = vmatprep.subr.bf16.mxu0 %v5297_v0  ;;  %1317 = vmatprep.subr.bf16.mxu1 %v5297_v0  ;;  %5808 = vst [vmem:[#allocation17_spill] sm:$0xff] %v5320_v8  ;;  %v5327_v0 = vld [vmem:[%s5753_s1 + $0x264] ss:$8 sps:$4 sm:$0xff]  }
  0xd9   : > { %5809 = vst [vmem:[#allocation18_spill] sm:$0xff] %v5327_v0 }
  0xdb   : > { %1095 = vmatpush1.bf16.msra.mxu0 %v5304_v4  ;;  %1318 = vmatpush1.bf16.msra.mxu1 %v5304_v4  ;;  %v1302_v4 = vshrl.u32 %v3778_v2, 16  ;;  %v4561_v2 = vld [vmem:[%s5753_s1 + $0x80] ss:$8 sps:$4 sm:$0xff]  }
  0xdc   : > { %1096 = vmatprep.subr.bf16.mxu0 %v5311_v7  ;;  %1319 = vmatprep.subr.bf16.mxu1 %v5311_v7  ;;  %v5341_v7 = vld [vmem:[%s5753_s1 + $0x274] ss:$8 sps:$4 sm:$0xff]  }
  0xdf   : > { %1097 = vmatpush1.bf16.msra.mxu0 %v5320_v8  ;;  %1320 = vmatpush1.bf16.msra.mxu1 %v5320_v8  ;;  %v5348_v8 = vld [vmem:[%s5753_s1 + $0x270] ss:$8 sps:$4 sm:$0xff]  }
  0xe0   : > { %1098 = vmatprep.subr.bf16.mxu0 %v5327_v0  ;;  %1321 = vmatprep.subr.bf16.mxu1 %v5327_v0  ;;  %5810 = vst [vmem:[#allocation19_spill] sm:$0xff] %v5348_v8  ;;  %v5352_v0 = vor.u32 %v1306_v20, %v1302_v4  ;;  %v4562_v20 = vld [vmem:[%s5753_s1 + $0x94] ss:$8 sps:$4 sm:$0xff]   ;;  %v5811_v4 = vmov 0  }
  0xe3   : > { %1099 = vmatpush1.bf16.msra.mxu0 %v5334_v18  ;;  %1322 = vmatpush1.bf16.msra.mxu1 %v5334_v18 }
  0xe4   : > { %1100 = vmatprep.subr.bf16.mxu0 %v5341_v7  ;;  %1323 = vmatprep.subr.bf16.mxu1 %v5341_v7 }
  0xe7   : > { %1101 = vmatpush1.bf16.msra.mxu0 %v5348_v8  ;;  %1324 = vmatpush1.bf16.msra.mxu1 %v5348_v8  ;;  %v4566_v8 = vld [vmem:[%s5753_s1 + $0xb4] ss:$8 sps:$4 sm:$0xff]  }
  0xe8   : > { %1364 = vmatprep.subr.bf16.mxu0 %v4560_v36  ;;  %1587 = vmatprep.subr.bf16.mxu1 %v4560_v36  ;;  %v4563_v36 = vld [vmem:[%s5753_s1 + $0x90] ss:$8 sps:$4 sm:$0xff]  }
  0xea   : > { %1119 = vmatmul.mubr.bf16.vlgmr.msra.gmra.mrb[0].mxu0 %v5237_v11  ;;  %1342 = vmatmul.mubr.bf16.vlgmr.msra.gmra.mrb[0].mxu1 %v5352_v0 }
  0xeb   : > { %1365 = vmatpush1.bf16.msra.mxu0 %v4561_v2  ;;  %1588 = vmatpush1.bf16.msra.mxu1 %v4561_v2  ;;  %v4564_v2 = vld [vmem:[%s5753_s1 + $0xa4] ss:$8 sps:$4 sm:$0xff]  }
  0xec   : > { %1366 = vmatprep.subr.bf16.mxu0 %v4562_v20  ;;  %1589 = vmatprep.subr.bf16.mxu1 %v4562_v20  ;;  %v4565_v20 = vld [vmem:[%s5753_s1 + $0xa0] ss:$8 sps:$4 sm:$0xff]  }
  0xed   : > { %1396 = vmatprep.mubr.bf16.mxu0 %v5811_v4  ;;  %1619 = vmatprep.mubr.bf16.mxu1 %v5811_v4 }
  0xef   : > { %1367 = vmatpush1.bf16.msra.mxu0 %v4563_v36  ;;  %1590 = vmatpush1.bf16.msra.mxu1 %v4563_v36  ;;  %v4567_v36 = vld [vmem:[%s5753_s1 + $0xb0] ss:$8 sps:$4 sm:$0xff]  }
  0xf0   : > { %1368 = vmatprep.subr.bf16.mxu0 %v4564_v2  ;;  %1591 = vmatprep.subr.bf16.mxu1 %v4564_v2  ;;  %v4568_v2 = vld [vmem:[%s5753_s1 + $0xc4] ss:$8 sps:$4 sm:$0xff]  }
  0xf3   : > { %1369 = vmatpush1.bf16.msra.mxu0 %v4565_v20  ;;  %1592 = vmatpush1.bf16.msra.mxu1 %v4565_v20  ;;  %v4569_v20 = vld [vmem:[%s5753_s1 + $0xc0] ss:$8 sps:$4 sm:$0xff]  }
  0xf4   : > { %1370 = vmatprep.subr.bf16.mxu0 %v4566_v8  ;;  %1593 = vmatprep.subr.bf16.mxu1 %v4566_v8  ;;  %v4570_v8 = vld [vmem:[%s5753_s1 + $0xd4] ss:$8 sps:$4 sm:$0xff]  }
  0xf7   : > { %1371 = vmatpush1.bf16.msra.mxu0 %v4567_v36  ;;  %1594 = vmatpush1.bf16.msra.mxu1 %v4567_v36  ;;  %v4571_v36 = vld [vmem:[%s5753_s1 + $0xd0] ss:$8 sps:$4 sm:$0xff]  }
  0xf8   : > { %1372 = vmatprep.subr.bf16.mxu0 %v4568_v2  ;;  %1595 = vmatprep.subr.bf16.mxu1 %v4568_v2 }
  0xfb   : > { %1373 = vmatpush1.bf16.msra.mxu0 %v4569_v20  ;;  %1596 = vmatpush1.bf16.msra.mxu1 %v4569_v20  ;;  %v4413_v20 = vld [vmem:[#allocation2 + $0x14] ss:$8 sps:$4 sm:$0xff]  }
  0xfc   : > { %1374 = vmatprep.subr.bf16.mxu0 %v4570_v8  ;;  %1597 = vmatprep.subr.bf16.mxu1 %v4570_v8  ;;  %v4411_v8 = vld [vmem:[#allocation2 + $0x10] ss:$8 sps:$4 sm:$0xff]  }
  0xff   : > { %1375 = vmatpush1.bf16.msra.mxu0 %v4571_v36  ;;  %1598 = vmatpush1.bf16.msra.mxu1 %v4571_v36  ;;  %v4416_v36 = vld [vmem:[#allocation2 + $0x24] ss:$8 sps:$4 sm:$0xff]  }
 0x100   : > { %1376 = vmatprep.subr.bf16.mxu0 %v4838_v13  ;;  %1599 = vmatprep.subr.bf16.mxu1 %v4838_v13  ;;  %v4572_v13 = vld [vmem:[%s4866_s21 + $0x8] sm:$0xf] }
 0x103   : > { %1377 = vmatpush1.bf16.msra.mxu0 %v4846_v14  ;;  %1600 = vmatpush1.bf16.msra.mxu1 %v4846_v14  ;;  %v3780_v14 = vcombine.low %v4572_v13, %v4572_v13 }
 0x104   : > { %1378 = vmatprep.subr.bf16.mxu0 %v4853_v15  ;;  %1601 = vmatprep.subr.bf16.mxu1 %v4853_v15 }
 0x105   : > { %v1538_v15 = vshll.u32 %v3780_v14, 16 }
 0x107   : > { %1379 = vmatpush1.bf16.msra.mxu0 %v4861_v16  ;;  %1602 = vmatpush1.bf16.msra.mxu1 %v4861_v16  ;;  %v1536_v16 = vshrl.u32 %v3780_v14, 16  ;;  %v4419_v14 = vld [vmem:[#allocation2 + $0x34] ss:$8 sps:$4 sm:$0xff]  }
 0x108   : > { %1405 = vmatprep.subr.bf16.mxu0 %v4873_v17  ;;  %1628 = vmatprep.subr.bf16.mxu1 %v4873_v17  ;;  %v1540_v17 = vrot.slane %v1538_v15, 1  ;;  %v4417_v15 = vld [vmem:[#allocation2 + $0x30] ss:$8 sps:$4 sm:$0xff]  }
 0x10a   : > { %1397 = vmatmul.mubr.bf16.vlgmr.msra.gmra.mrb[4].mxu0 %v5122_v54  ;;  %1620 = vmatmul.mubr.bf16.vlgmr.msra.gmra.mrb[4].mxu1 %v5237_v11 }
 0x10b   : > { %1406 = vmatpush1.bf16.msra.mxu0 %v4883_v19  ;;  %1629 = vmatpush1.bf16.msra.mxu1 %v4883_v19  ;;  %v1541_v19 = vor.u32 %v1540_v17, %v1536_v16  ;;  %v4422_v16 = vld [vmem:[#allocation2 + $0x44] ss:$8 sps:$4 sm:$0xff]   ;;  %v4420_v17 = vld [vmem:[#allocation2 + $0x40] ss:$8 sps:$4 sm:$0xff]  }
 0x10c   : > { %1407 = vmatprep.subr.bf16.mxu0 %v4893_v21  ;;  %1630 = vmatprep.subr.bf16.mxu1 %v4893_v21  ;;  %v5812_v21 = vld [vmem:[#allocation8_spill] sm:$0xff] }
 0x10d   : > { %1437 = vmatprep.mubr.bf16.mxu0 %v5811_v4  ;;  %1660 = vmatprep.mubr.bf16.mxu1 %v5811_v4 }
 0x10f   : > { %1408 = vmatpush1.bf16.msra.mxu0 %v4902_v22  ;;  %1631 = vmatpush1.bf16.msra.mxu1 %v4902_v22  ;;  %v5813_v22 = vld [vmem:[#allocation9_spill] sm:$0xff] }
 0x110   : > { %1409 = vmatprep.subr.bf16.mxu0 %v4909_v23  ;;  %1632 = vmatprep.subr.bf16.mxu1 %v4909_v23  ;;  %v5814_v23 = vld [vmem:[#allocation10_spill] sm:$0xff] }
 0x113   : > { %1410 = vmatpush1.bf16.msra.mxu0 %v4918_v24  ;;  %1633 = vmatpush1.bf16.msra.mxu1 %v4918_v24  ;;  %v5816_v24 = vld [vmem:[#allocation12_spill] sm:$0xff] }
 0x114   : > { %1411 = vmatprep.subr.bf16.mxu0 %v4925_v25  ;;  %1634 = vmatprep.subr.bf16.mxu1 %v4925_v25  ;;  %v5817_v25 = vld [vmem:[#allocation13_spill] sm:$0xff] }
 0x117   : > { %1412 = vmatpush1.bf16.msra.mxu0 %v4932_v26  ;;  %1635 = vmatpush1.bf16.msra.mxu1 %v4932_v26  ;;  %v5818_v26 = vld [vmem:[#allocation14_spill] sm:$0xff] }
 0x118   : > { %1413 = vmatprep.subr.bf16.mxu0 %v4939_v27  ;;  %1636 = vmatprep.subr.bf16.mxu1 %v4939_v27  ;;  %v3781_v27 = vcombine.low %v5122_v54, %v5122_v54 }
 0x11b   : > { %1414 = vmatpush1.bf16.msra.mxu0 %v4946_v28  ;;  %1637 = vmatpush1.bf16.msra.mxu1 %v4946_v28  ;;  %v5819_v28 = vld [vmem:[#allocation15_spill] sm:$0xff] }
 0x11c   : > { %1415 = vmatprep.subr.bf16.mxu0 %v4953_v29  ;;  %1638 = vmatprep.subr.bf16.mxu1 %v4953_v29  ;;  %v5820_v29 = vld [vmem:[#allocation16_spill] sm:$0xff] }
 0x11f   : > { %1416 = vmatpush1.bf16.msra.mxu0 %v4960_v30  ;;  %1639 = vmatpush1.bf16.msra.mxu1 %v4960_v30  ;;  %v1761_v30 = vshll.u32 %v3781_v27, 16 }
 0x120   : > { %1417 = vmatprep.subr.bf16.mxu0 %v4967_v31  ;;  %1640 = vmatprep.subr.bf16.mxu1 %v4967_v31  ;;  %v5821_v31 = vld [vmem:[#allocation17_spill] sm:$0xff] }
 0x123   : > { %1418 = vmatpush1.bf16.msra.mxu0 %v4972_v32  ;;  %1641 = vmatpush1.bf16.msra.mxu1 %v4972_v32  ;;  %v5822_v32 = vld [vmem:[#allocation18_spill] sm:$0xff] }
 0x124   : > { %1419 = vmatprep.subr.bf16.mxu0 %v4977_v33  ;;  %1642 = vmatprep.subr.bf16.mxu1 %v4977_v33  ;;  %v1759_v33 = vshrl.u32 %v3781_v27, 16 }
 0x127   : > { %1420 = vmatpush1.bf16.msra.mxu0 %v4986_v34  ;;  %1643 = vmatpush1.bf16.msra.mxu1 %v4986_v34  ;;  %v1763_v34 = vrot.slane %v1761_v30, 1 }
 0x128   : > { %1446 = vmatprep.subr.bf16.mxu0 %v4991_v35  ;;  %1669 = vmatprep.subr.bf16.mxu1 %v4991_v35  ;;  %v4386_v35 = vld [vmem:[#allocation2 + $0x84] ss:$8 sps:$4 sm:$0xff]  }
 0x12a   : > { %1438 = vmatmul.mubr.bf16.vlgmr.msra.gmra.mrb[4].mxu0 %v4572_v13  ;;  %1661 = vmatmul.mubr.bf16.vlgmr.msra.gmra.mrb[4].mxu1 %v5122_v54  ;;  %v4410_v54 = vld [vmem:[#allocation2 + $0x4] ss:$8 sps:$4 sm:$0xff]   ;;  %v4414_v13 = vld [vmem:[#allocation2 + $0x20] ss:$8 sps:$4 sm:$0xff]  }
 0x12b   : > { %1447 = vmatpush1.bf16.msra.mxu0 %v5003_v37  ;;  %1670 = vmatpush1.bf16.msra.mxu1 %v5003_v37  ;;  %v1764_v37 = vor.u32 %v1763_v34, %v1759_v33 }
 0x12c   : > { %1448 = vmatprep.subr.bf16.mxu0 %v5008_v38  ;;  %1671 = vmatprep.subr.bf16.mxu1 %v5008_v38  ;;  %v5823_v38 = vld [vmem:[#allocation19_spill] sm:$0xff] }
 0x12d   : > { %1478 = vmatprep.mubr.bf16.mxu0 %v5811_v4  ;;  %1701 = vmatprep.mubr.bf16.mxu1 %v5811_v4 }
 0x12f   : > { %1449 = vmatpush1.bf16.msra.mxu0 %v5017_v39  ;;  %1672 = vmatpush1.bf16.msra.mxu1 %v5017_v39  ;;  %v4384_v39 = vld [vmem:[#allocation2 + $0x80] ss:$8 sps:$4 sm:$0xff]  }
 0x130   : > { %1450 = vmatprep.subr.bf16.mxu0 %v5024_v40  ;;  %1673 = vmatprep.subr.bf16.mxu1 %v5024_v40  ;;  %v4389_v40 = vld [vmem:[#allocation2 + $0x94] ss:$8 sps:$4 sm:$0xff]  }
 0x133   : > { %1451 = vmatpush1.bf16.msra.mxu0 %v5033_v41  ;;  %1674 = vmatpush1.bf16.msra.mxu1 %v5033_v41  ;;  %v4387_v41 = vld [vmem:[#allocation2 + $0x90] ss:$8 sps:$4 sm:$0xff]  }
 0x134   : > { %1452 = vmatprep.subr.bf16.mxu0 %v5040_v42  ;;  %1675 = vmatprep.subr.bf16.mxu1 %v5040_v42  ;;  %v4392_v42 = vld [vmem:[#allocation2 + $0xa4] ss:$8 sps:$4 sm:$0xff]  }
 0x137   : > { %1453 = vmatpush1.bf16.msra.mxu0 %v5049_v43  ;;  %1676 = vmatpush1.bf16.msra.mxu1 %v5049_v43  ;;  %v4390_v43 = vld [vmem:[#allocation2 + $0xa0] ss:$8 sps:$4 sm:$0xff]  }
 0x138   : > { %1454 = vmatprep.subr.bf16.mxu0 %v5054_v44  ;;  %1677 = vmatprep.subr.bf16.mxu1 %v5054_v44  ;;  %v4395_v44 = vld [vmem:[#allocation2 + $0xb4] ss:$8 sps:$4 sm:$0xff]  }
 0x13b   : > { %1455 = vmatpush1.bf16.msra.mxu0 %v5063_v45  ;;  %1678 = vmatpush1.bf16.msra.mxu1 %v5063_v45  ;;  %v4393_v45 = vld [vmem:[#allocation2 + $0xb0] ss:$8 sps:$4 sm:$0xff]  }
 0x13c   : > { %1456 = vmatprep.subr.bf16.mxu0 %v5068_v46  ;;  %1679 = vmatprep.subr.bf16.mxu1 %v5068_v46  ;;  %v4398_v46 = vld [vmem:[#allocation2 + $0xc4] ss:$8 sps:$4 sm:$0xff]  }
 0x13f   : > { %1457 = vmatpush1.bf16.msra.mxu0 %v5077_v47  ;;  %1680 = vmatpush1.bf16.msra.mxu1 %v5077_v47  ;;  %v4396_v47 = vld [vmem:[#allocation2 + $0xc0] ss:$8 sps:$4 sm:$0xff]  }
 0x140   : > { %1458 = vmatprep.subr.bf16.mxu0 %v5082_v48  ;;  %1681 = vmatprep.subr.bf16.mxu1 %v5082_v48  ;;  %v4401_v48 = vld [vmem:[#allocation2 + $0xd4] ss:$8 sps:$4 sm:$0xff]  }
 0x143   : > { %1459 = vmatpush1.bf16.msra.mxu0 %v5091_v49  ;;  %1682 = vmatpush1.bf16.msra.mxu1 %v5091_v49  ;;  %v4399_v49 = vld [vmem:[#allocation2 + $0xd0] ss:$8 sps:$4 sm:$0xff]  }
 0x144   : > { %1460 = vmatprep.subr.bf16.mxu0 %v5096_v50  ;;  %1683 = vmatprep.subr.bf16.mxu1 %v5096_v50  ;;  %v4404_v50 = vld [vmem:[#allocation2 + $0xe4] ss:$8 sps:$4 sm:$0xff]  }
 0x147   : > { %1461 = vmatpush1.bf16.msra.mxu0 %v5105_v51  ;;  %1684 = vmatpush1.bf16.msra.mxu1 %v5105_v51  ;;  %v4402_v51 = vld [vmem:[#allocation2 + $0xe0] ss:$8 sps:$4 sm:$0xff]  }
 0x148   : > { %1489 = vmatprep.subr.bf16.mxu0 %v5110_v52  ;;  %1712 = vmatprep.subr.bf16.mxu1 %v5110_v52  ;;  %v4407_v52 = vld [vmem:[#allocation2 + $0xf4] ss:$8 sps:$4 sm:$0xff]  }
 0x14a   : > { %1479 = vmatmul.mubr.bf16.vlgmr.msra.gmra.mrb[4].mxu0 %v5237_v11  ;;  %1702 = vmatmul.mubr.bf16.vlgmr.msra.gmra.mrb[4].mxu1 %v5352_v0 }
 0x14b   : > { %1490 = vmatpush1.bf16.msra.mxu0 %v5119_v53  ;;  %1713 = vmatpush1.bf16.msra.mxu1 %v5119_v53  ;;  %v4405_v53 = vld [vmem:[#allocation2 + $0xf0] ss:$8 sps:$4 sm:$0xff]  }
 0x14c   : > { %1491 = vmatprep.subr.bf16.mxu0 %v5127_v55  ;;  %1714 = vmatprep.subr.bf16.mxu1 %v5127_v55 }
 0x14d   : > { %1521 = vmatprep.mubr.bf16.mxu0 %v5811_v4  ;;  %1744 = vmatprep.mubr.bf16.mxu1 %v5811_v4 }
 0x14f   : > { %1492 = vmatpush1.bf16.msra.mxu0 %v5136_v56  ;;  %1715 = vmatpush1.bf16.msra.mxu1 %v5136_v56 }
 0x150   : > { %1493 = vmatprep.subr.bf16.mxu0 %v5143_v57  ;;  %1716 = vmatprep.subr.bf16.mxu1 %v5143_v57 }
 0x153   : > { %1494 = vmatpush1.bf16.msra.mxu0 %v5152_v58  ;;  %1717 = vmatpush1.bf16.msra.mxu1 %v5152_v58 }
 0x154   : > { %1495 = vmatprep.subr.bf16.mxu0 %v5159_v59  ;;  %1718 = vmatprep.subr.bf16.mxu1 %v5159_v59 }
 0x157   : > { %1496 = vmatpush1.bf16.msra.mxu0 %v5168_v60  ;;  %1719 = vmatpush1.bf16.msra.mxu1 %v5168_v60 }
 0x158   : > { %1497 = vmatprep.subr.bf16.mxu0 %v5173_v61  ;;  %1720 = vmatprep.subr.bf16.mxu1 %v5173_v61 }
 0x15b   : > { %1498 = vmatpush1.bf16.msra.mxu0 %v5182_v62  ;;  %1721 = vmatpush1.bf16.msra.mxu1 %v5182_v62 }
 0x15c   : > { %1499 = vmatprep.subr.bf16.mxu0 %v5187_v63  ;;  %1722 = vmatprep.subr.bf16.mxu1 %v5187_v63  ;;  %v3779_v63 = vld [vmem:[%s5754_s2] ss:$0 sm:$0xff] }
 0x15f   : > { %1500 = vmatpush1.bf16.msra.mxu0 %v5196_v1  ;;  %1723 = vmatpush1.bf16.msra.mxu1 %v5196_v1 }
 0x160   : > { %1501 = vmatprep.subr.bf16.mxu0 %v5203_v3  ;;  %1724 = vmatprep.subr.bf16.mxu1 %v5203_v3 }
 0x163   : > { %1502 = vmatpush1.bf16.msra.mxu0 %v5214_v5  ;;  %1725 = vmatpush1.bf16.msra.mxu1 %v5214_v5 }
 0x164   : > { %1503 = vmatprep.subr.bf16.mxu0 %v5221_v6  ;;  %1726 = vmatprep.subr.bf16.mxu1 %v5221_v6 }
 0x167   : > { %1504 = vmatpush1.bf16.msra.mxu0 %v5228_v9  ;;  %1727 = vmatpush1.bf16.msra.mxu1 %v5228_v9 }
 0x168   : > { %1543 = vmatprep.subr.bf16.mxu0 %v5235_v10  ;;  %1766 = vmatprep.subr.bf16.mxu1 %v5235_v10 }
 0x16a   : > { %1522 = vmatmul.mubr.bf16.vlgmr.msra.gmra.mrb[4].mxu0 %v5352_v0  ;;  %1745 = vmatmul.mubr.bf16.vlgmr.msra.gmra.mrb[4].mxu1 %v1541_v19  ;;  %v5815_v0 = vld [vmem:[#allocation11_spill] sm:$0xff] }
 0x16b   : > { %1544 = vmatpush1.bf16.msra.mxu0 %v5244_v12  ;;  %1767 = vmatpush1.bf16.msra.mxu1 %v5244_v12 }
 0x16c   : > { %1545 = vmatprep.subr.bf16.mxu0 %v5812_v21  ;;  %1768 = vmatprep.subr.bf16.mxu1 %v5812_v21  ;;  %v4423_v21 = vld [vmem:[#allocation2 + $0x50] ss:$8 sps:$4 sm:$0xff]  }
 0x16d   : > { %1575 = vmatprep.mubr.bf16.mxu0 %v5811_v4  ;;  %1798 = vmatprep.mubr.bf16.mxu1 %v5811_v4 }
 0x16f   : > { %1546 = vmatpush1.bf16.msra.mxu0 %v5813_v22  ;;  %1769 = vmatpush1.bf16.msra.mxu1 %v5813_v22  ;;  %v5562_v22 = vld [vmem:[#allocation2 + $0x64] ss:$8 sps:$4 sm:$0xff]  }
 0x170   : > { %1547 = vmatprep.subr.bf16.mxu0 %v5814_v23  ;;  %1770 = vmatprep.subr.bf16.mxu1 %v5814_v23  ;;  %v5564_v23 = vld [vmem:[#allocation2 + $0x60] ss:$8 sps:$4 sm:$0xff]  }
 0x173   : > { %1548 = vmatpush1.bf16.msra.mxu0 %v5815_v0  ;;  %1771 = vmatpush1.bf16.msra.mxu1 %v5815_v0  ;;  %v5567_v0 = vld [vmem:[#allocation2 + $0x74] ss:$8 sps:$4 sm:$0xff]  }
 0x174   : > { %1549 = vmatprep.subr.bf16.mxu0 %v5816_v24  ;;  %1772 = vmatprep.subr.bf16.mxu1 %v5816_v24  ;;  %v5570_v24 = vld [vmem:[#allocation2 + $0x70] ss:$8 sps:$4 sm:$0xff]  }
 0x177   : > { %1550 = vmatpush1.bf16.msra.mxu0 %v5817_v25  ;;  %1773 = vmatpush1.bf16.msra.mxu1 %v5817_v25  ;;  %v5573_v25 = vld [vmem:[#allocation2 + $0x104] ss:$8 sps:$4 sm:$0xff]  }
 0x178   : > { %1551 = vmatprep.subr.bf16.mxu0 %v5818_v26  ;;  %1774 = vmatprep.subr.bf16.mxu1 %v5818_v26 }
 0x17b   : > { %1552 = vmatpush1.bf16.msra.mxu0 %v5819_v28  ;;  %1775 = vmatpush1.bf16.msra.mxu1 %v5819_v28 }
 0x17c   : > { %1553 = vmatprep.subr.bf16.mxu0 %v5820_v29  ;;  %1776 = vmatprep.subr.bf16.mxu1 %v5820_v29 }
 0x17f   : > { %1554 = vmatpush1.bf16.msra.mxu0 %v5821_v31  ;;  %1777 = vmatpush1.bf16.msra.mxu1 %v5821_v31 }
 0x180   : > { %1555 = vmatprep.subr.bf16.mxu0 %v5822_v32  ;;  %1778 = vmatprep.subr.bf16.mxu1 %v5822_v32 }
 0x183   : > { %1556 = vmatpush1.bf16.msra.mxu0 %v5334_v18  ;;  %1779 = vmatpush1.bf16.msra.mxu1 %v5334_v18  ;;  %v4408_v18 = vld [vmem:[#allocation2] ss:$8 sps:$4 sm:$0xff]  }
 0x184   : > { %1557 = vmatprep.subr.bf16.mxu0 %v5341_v7  ;;  %1780 = vmatprep.subr.bf16.mxu1 %v5341_v7 }
 0x187   : > { %1558 = vmatpush1.bf16.msra.mxu0 %v5823_v38  ;;  %1781 = vmatpush1.bf16.msra.mxu1 %v5823_v38 }
 0x188   : > { %2529 = vmatprep.subr.bf16.mxu1 %v4386_v35  ;;  %1927 = vmatprep.subr.bf16.mxu0 %v4386_v35 }
 0x18a   : > { %1576 = vmatmul.mubr.bf16.vlgmr.msra.gmra.mrb[4].mxu0 %v1541_v19  ;;  %1799 = vmatmul.mubr.bf16.vlgmr.msra.gmra.mrb[4].mxu1 %v1764_v37  ;;  %v4425_v19 = vld [vmem:[#allocation2 + $0x54] ss:$8 sps:$4 sm:$0xff]  }
 0x18b   : > { %2530 = vmatpush1.bf16.msra.mxu1 %v4384_v39  ;;  %2561 = vmatprep.mubr.bf16.mxu1 %v5811_v4 }
 0x18c   : > { %2531 = vmatprep.subr.bf16.mxu1 %v4389_v40  ;;  %1928 = vmatpush1.bf16.msra.mxu0 %v4384_v39 }
 0x18d   : > { %1929 = vmatprep.subr.bf16.mxu0 %v4389_v40  ;;  %1959 = vmatprep.mubr.bf16.mxu0 %v5811_v4  ;;  %v4432_v40 = vld [vmem:[#allocation2 + $0x100] ss:$8 sps:$4 sm:$0xff]  }
 0x18f   : > { %2532 = vmatpush1.bf16.msra.mxu1 %v4387_v41 }
 0x190   : > { %2533 = vmatprep.subr.bf16.mxu1 %v4392_v42  ;;  %1930 = vmatpush1.bf16.msra.mxu0 %v4387_v41 }
 0x191   : > { %1931 = vmatprep.subr.bf16.mxu0 %v4392_v42  ;;  %v4437_v42 = vld [vmem:[#allocation2 + $0x114] ss:$8 sps:$4 sm:$0xff]  }
 0x193   : > { %2534 = vmatpush1.bf16.msra.mxu1 %v4390_v43 }
 0x194   : > { %2535 = vmatprep.subr.bf16.mxu1 %v4395_v44  ;;  %1932 = vmatpush1.bf16.msra.mxu0 %v4390_v43  ;;  %v4435_v43 = vld [vmem:[#allocation2 + $0x110] ss:$8 sps:$4 sm:$0xff]  }
 0x195   : > { %1933 = vmatprep.subr.bf16.mxu0 %v4395_v44  ;;  %v4440_v44 = vld [vmem:[#allocation2 + $0x124] ss:$8 sps:$4 sm:$0xff]  }
 0x197   : > { %2536 = vmatpush1.bf16.msra.mxu1 %v4393_v45 }
 0x198   : > { %2537 = vmatprep.subr.bf16.mxu1 %v4398_v46  ;;  %1934 = vmatpush1.bf16.msra.mxu0 %v4393_v45  ;;  %v4438_v45 = vld [vmem:[#allocation2 + $0x120] ss:$8 sps:$4 sm:$0xff]  }
 0x199   : > { %1935 = vmatprep.subr.bf16.mxu0 %v4398_v46  ;;  %v4443_v46 = vld [vmem:[#allocation2 + $0x134] ss:$8 sps:$4 sm:$0xff]  }
 0x19b   : > { %2538 = vmatpush1.bf16.msra.mxu1 %v4396_v47 }
 0x19c   : > { %2539 = vmatprep.subr.bf16.mxu1 %v4401_v48  ;;  %1936 = vmatpush1.bf16.msra.mxu0 %v4396_v47  ;;  %v4441_v47 = vld [vmem:[#allocation2 + $0x130] ss:$8 sps:$4 sm:$0xff]  }
 0x19d   : > { %1937 = vmatprep.subr.bf16.mxu0 %v4401_v48  ;;  %v4446_v48 = vld [vmem:[#allocation2 + $0x144] ss:$8 sps:$4 sm:$0xff]  }
 0x19f   : > { %2540 = vmatpush1.bf16.msra.mxu1 %v4399_v49 }
 0x1a0   : > { %2541 = vmatprep.subr.bf16.mxu1 %v4404_v50  ;;  %1938 = vmatpush1.bf16.msra.mxu0 %v4399_v49  ;;  %v4444_v49 = vld [vmem:[#allocation2 + $0x140] ss:$8 sps:$4 sm:$0xff]  }
 0x1a1   : > { %1939 = vmatprep.subr.bf16.mxu0 %v4404_v50  ;;  %v4449_v50 = vld [vmem:[#allocation2 + $0x154] ss:$8 sps:$4 sm:$0xff]  }
 0x1a3   : > { %2542 = vmatpush1.bf16.msra.mxu1 %v4402_v51 }
 0x1a4   : > { %2543 = vmatprep.subr.bf16.mxu1 %v4407_v52  ;;  %1940 = vmatpush1.bf16.msra.mxu0 %v4402_v51  ;;  %v4447_v51 = vld [vmem:[#allocation2 + $0x150] ss:$8 sps:$4 sm:$0xff]  }
 0x1a5   : > { %1941 = vmatprep.subr.bf16.mxu0 %v4407_v52  ;;  %v4452_v52 = vld [vmem:[#allocation2 + $0x164] ss:$8 sps:$4 sm:$0xff]  }
 0x1a7   : > { %2544 = vmatpush1.bf16.msra.mxu1 %v4405_v53 }
 0x1a8   : > { %2570 = vmatprep.subr.bf16.mxu1 %v4410_v54  ;;  %1942 = vmatpush1.bf16.msra.mxu0 %v4405_v53  ;;  %v4450_v53 = vld [vmem:[#allocation2 + $0x160] ss:$8 sps:$4 sm:$0xff]  }
 0x1a9   : > { %2048 = vmatprep.subr.bf16.mxu0 %v4410_v54  ;;  %v4455_v54 = vld [vmem:[#allocation2 + $0x174] ss:$8 sps:$4 sm:$0xff]  }
 0x1bd   : > { %v1120_v55 = vpop.f32.mrb[0].mxu0  ;;  %v1343_v56 = vpop.f32.mrb[0].mxu1 }
 0x1be   : > { %v1122_v57 = vpop.f32.mrb[1].mxu0  ;;  %v1345_v58 = vpop.f32.mrb[1].mxu1 }
 0x1bf   : > { %v1129_v59 = vmax.f32 %v1120_v55, %v1122_v57  ;;  %v1352_v60 = vmax.f32 %v1343_v56, %v1345_v58  ;;  %v1124_v61 = vpop.f32.mrb[2].mxu0  ;;  %v1347_v62 = vpop.f32.mrb[2].mxu1  ;;  %v4453_v56 = vld [vmem:[#allocation2 + $0x170] ss:$8 sps:$4 sm:$0xff]   ;;  %v4458_v58 = vld [vmem:[#allocation2 + $0x184] ss:$8 sps:$4 sm:$0xff]  }
 0x1c0   : > { %v1125_v1 = vpop.f32.mrb[3].mxu0  ;;  %v1348_v3 = vpop.f32.mrb[3].mxu1  ;;  %v4461_v62 = vld [vmem:[#allocation2 + $0x194] ss:$8 sps:$4 sm:$0xff]  }
 0x1c1   : > { %v1353_v5 = vmax.f32 %v1129_v59, %v1352_v60  ;;  %v4456_v60 = vld [vmem:[#allocation2 + $0x180] ss:$8 sps:$4 sm:$0xff]   ;;  %v4464_v1 = vld [vmem:[#allocation2 + $0x1a4] ss:$8 sps:$4 sm:$0xff]  }
 0x1c2   : > { %v4462_v3 = vld [vmem:[#allocation2 + $0x1a0] ss:$8 sps:$4 sm:$0xff]  }
 0x1c3   : > { %v1361_v6 = vadd.f32 %v3779_v63, %v1353_v5  ;;  %v4467_v5 = vld [vmem:[#allocation2 + $0x1b4] ss:$8 sps:$4 sm:$0xff]  }
 0x1c5   : > { %v1362_v9 = vmax.f32 %v1361_v6, 0.0  ;;  %v4465_v6 = vld [vmem:[#allocation2 + $0x1b0] ss:$8 sps:$4 sm:$0xff]  }
 0x1c7   : > { %v5554_v10 = vpack.c.bf16 %v1362_v9, %v1362_v9  ;;  %v4470_v9 = vld [vmem:[#allocation2 + $0x1c4] ss:$8 sps:$4 sm:$0xff]  }
 0x1c9   : > { %v2109_v11 = vshll.u32 %v5554_v10, 16  ;;  %v2107_v12 = vshrl.u32 %v5554_v10, 16 }
 0x1cb   : > { %v2111_v7 = vrot.slane %v2109_v11, 1  ;;  %v4468_v11 = vld [vmem:[#allocation2 + $0x1c0] ss:$8 sps:$4 sm:$0xff]  }
 0x1cd   : > { %v5558_v2 = vor.u32 %v2111_v7, %v2107_v12  ;;  %v4473_v12 = vld [vmem:[#allocation2 + $0x1d4] ss:$8 sps:$4 sm:$0xff]   ;;  %v4471_v7 = vld [vmem:[#allocation2 + $0x1d0] ss:$8 sps:$4 sm:$0xff]  }
 0x1cf   : > { %2562 = vmatmul.mubr.bf16.vlgmr.msra.gmra.mrb[8].mxu1 %v5558_v2 }
 0x1d0   : > { %2571 = vmatpush1.bf16.msra.mxu1 %v4408_v18  ;;  %2602 = vmatprep.mubr.bf16.mxu1 %v5811_v4 }
 0x1d1   : > { %2572 = vmatprep.subr.bf16.mxu1 %v4413_v20 }
 0x1d4   : > { %2573 = vmatpush1.bf16.msra.mxu1 %v4411_v8 }
 0x1d5   : > { %2574 = vmatprep.subr.bf16.mxu1 %v4416_v36 }
 0x1d8   : > { %2575 = vmatpush1.bf16.msra.mxu1 %v4414_v13 }
 0x1d9   : > { %2576 = vmatprep.subr.bf16.mxu1 %v4419_v14 }
 0x1dc   : > { %2577 = vmatpush1.bf16.msra.mxu1 %v4417_v15 }
 0x1dd   : > { %2578 = vmatprep.subr.bf16.mxu1 %v4422_v16 }
 0x1e0   : > { %2579 = vmatpush1.bf16.msra.mxu1 %v4420_v17 }
 0x1e1   : > { %2580 = vmatprep.subr.bf16.mxu1 %v4425_v19 }
 0x1e4   : > { %2581 = vmatpush1.bf16.msra.mxu1 %v4423_v21 }
 0x1e5   : > { %2582 = vmatprep.subr.bf16.mxu1 %v5562_v22 }
 0x1e8   : > { %2583 = vmatpush1.bf16.msra.mxu1 %v5564_v23 }
 0x1e9   : > { %2584 = vmatprep.subr.bf16.mxu1 %v5567_v0 }
 0x1ec   : > { %2585 = vmatpush1.bf16.msra.mxu1 %v5570_v24 }
 0x1ed   : > { %2611 = vmatprep.subr.bf16.mxu1 %v5573_v25 }
 0x25d   : > { %v1577_v26 = vpop.f32.mrb[4].mxu0  ;;  %v1800_v27 = vpop.f32.mrb[4].mxu1 }
 0x25e   : > { %v1579_v28 = vpop.f32.mrb[5].mxu0  ;;  %v1802_v29 = vpop.f32.mrb[5].mxu1 }
 0x25f   : > { %v1586_v30 = vmax.f32 %v1577_v26, %v1579_v28  ;;  %v1809_v31 = vmax.f32 %v1800_v27, %v1802_v29  ;;  %v1581_v32 = vpop.f32.mrb[6].mxu0  ;;  %v1804_v33 = vpop.f32.mrb[6].mxu1  ;;  %v4500_v26 = vld [vmem:[#allocation2 + $0x264] ss:$8 sps:$4 sm:$0xff]   ;;  %v4498_v27 = vld [vmem:[#allocation2 + $0x260] ss:$8 sps:$4 sm:$0xff]  }
 0x260   : > { %v1582_v34 = vpop.f32.mrb[7].mxu0  ;;  %v1805_v35 = vpop.f32.mrb[7].mxu1  ;;  %v4503_v28 = vld [vmem:[#allocation2 + $0x274] ss:$8 sps:$4 sm:$0xff]   ;;  %v4501_v29 = vld [vmem:[#allocation2 + $0x270] ss:$8 sps:$4 sm:$0xff]  }
 0x261   : > { %v1810_v37 = vmax.f32 %v1586_v30, %v1809_v31  ;;  %v4504_v31 = vld [vmem:[#allocation4] sm:$0xff]   ;;  %v4506_v33 = vld [vmem:[#allocation4 + $0x8] sm:$0xff]   ;;  %v4508_v35 = vld [vmem:[#allocation4 + $0x10] sm:$0xff]  }
 0x262   : > { %v4505_v32 = vld [vmem:[#allocation4 + $0x40] sm:$0xff]   ;;  %v4507_v34 = vld [vmem:[#allocation4 + $0x48] sm:$0xff]  }
 0x263   : > { %v1811_v38 = vadd.f32 %v3779_v63, %v1810_v37  ;;  %v4459_v63 = vld [vmem:[#allocation2 + $0x190] ss:$8 sps:$4 sm:$0xff]  }
 0x264   : > { %v4510_v37 = vld [vmem:[#allocation4 + $0x18] sm:$0xff]  }
 0x265   : > { %v1812_v39 = vmax.f32 %v1811_v38, 0.0  ;;  %v4511_v38 = vld [vmem:[#allocation4 + $0x58] sm:$0xff]  }
 0x267   : > { %v5577_v41 = vpack.c.bf16 %v1812_v39, %v1812_v39  ;;  %v4512_v39 = vld [vmem:[#allocation4 + $0x20] sm:$0xff]  }
 0x269   : > { %1960 = vmatmul.mubr.bf16.vlgmr.msra.gmra.mrb[8].mxu0 %v5577_v41  ;;  %2603 = vmatmul.mubr.bf16.vlgmr.msra.gmra.mrb[8].mxu1 %v5577_v41  ;;  %v2257_v55 = vshll.u32 %v5577_v41, 16  ;;  %v2255_v59 = vshrl.u32 %v5577_v41, 16  ;;  %v2698_v30 = vrot.slane %v5577_v41, 1  ;;  %v4514_v41 = vld [vmem:[#allocation4 + $0x28] sm:$0xff]  }
 0x26a   : > { %2049 = vmatpush1.bf16.msra.mxu0 %v4408_v18  ;;  %2612 = vmatpush1.bf16.msra.mxu1 %v4432_v40  ;;  %v4476_v18 = vld [vmem:[#allocation2 + $0x1e4] ss:$8 sps:$4 sm:$0xff]  }
 0x26b   : > { %2050 = vmatprep.subr.bf16.mxu0 %v4413_v20  ;;  %2613 = vmatprep.subr.bf16.mxu1 %v4437_v42  ;;  %v2259_v57 = vrot.slane %v2257_v55, 1  ;;  %v4474_v20 = vld [vmem:[#allocation2 + $0x1e0] ss:$8 sps:$4 sm:$0xff]  }
 0x26c   : > { %2080 = vmatprep.mubr.bf16.mxu0 %v5811_v4  ;;  %2643 = vmatprep.mubr.bf16.mxu1 %v5811_v4 }
 0x26d   : > { %v5590_v61 = vor.u32 %v2259_v57, %v2255_v59  ;;  %v3862_v57 = vld [vmem:[%s5756_s4] ss:$0 sm:$0xff] }
 0x26e   : > { %2051 = vmatpush1.bf16.msra.mxu0 %v4411_v8  ;;  %2614 = vmatpush1.bf16.msra.mxu1 %v4435_v43  ;;  %v4479_v8 = vld [vmem:[#allocation2 + $0x1f4] ss:$8 sps:$4 sm:$0xff]  }
 0x26f   : > { %2052 = vmatprep.subr.bf16.mxu0 %v4416_v36  ;;  %2615 = vmatprep.subr.bf16.mxu1 %v4440_v44  ;;  %v4477_v36 = vld [vmem:[#allocation2 + $0x1f0] ss:$8 sps:$4 sm:$0xff]  }
 0x272   : > { %2053 = vmatpush1.bf16.msra.mxu0 %v4414_v13  ;;  %2616 = vmatpush1.bf16.msra.mxu1 %v4438_v45  ;;  %v4482_v13 = vld [vmem:[#allocation2 + $0x204] ss:$8 sps:$4 sm:$0xff]  }
 0x273   : > { %2054 = vmatprep.subr.bf16.mxu0 %v4419_v14  ;;  %2617 = vmatprep.subr.bf16.mxu1 %v4443_v46  ;;  %v4480_v14 = vld [vmem:[#allocation2 + $0x200] ss:$8 sps:$4 sm:$0xff]  }
 0x276   : > { %2055 = vmatpush1.bf16.msra.mxu0 %v4417_v15  ;;  %2618 = vmatpush1.bf16.msra.mxu1 %v4441_v47  ;;  %v2403_v15 = vrot.slane %v5554_v10, 1 }
 0x277   : > { %2056 = vmatprep.subr.bf16.mxu0 %v4422_v16  ;;  %2619 = vmatprep.subr.bf16.mxu1 %v4446_v48  ;;  %v4485_v16 = vld [vmem:[#allocation2 + $0x214] ss:$8 sps:$4 sm:$0xff]  }
 0x27a   : > { %2057 = vmatpush1.bf16.msra.mxu0 %v4420_v17  ;;  %2620 = vmatpush1.bf16.msra.mxu1 %v4444_v49  ;;  %v4483_v17 = vld [vmem:[#allocation2 + $0x210] ss:$8 sps:$4 sm:$0xff]  }
 0x27b   : > { %2058 = vmatprep.subr.bf16.mxu0 %v4425_v19  ;;  %2621 = vmatprep.subr.bf16.mxu1 %v4449_v50  ;;  %v4488_v19 = vld [vmem:[#allocation2 + $0x224] ss:$8 sps:$4 sm:$0xff]  }
 0x27e   : > { %2059 = vmatpush1.bf16.msra.mxu0 %v4423_v21  ;;  %2622 = vmatpush1.bf16.msra.mxu1 %v4447_v51  ;;  %v4486_v21 = vld [vmem:[#allocation2 + $0x220] ss:$8 sps:$4 sm:$0xff]  }
 0x27f   : > { %2060 = vmatprep.subr.bf16.mxu0 %v5562_v22  ;;  %2623 = vmatprep.subr.bf16.mxu1 %v4452_v52  ;;  %v4491_v22 = vld [vmem:[#allocation2 + $0x234] ss:$8 sps:$4 sm:$0xff]  }
 0x282   : > { %2061 = vmatpush1.bf16.msra.mxu0 %v5564_v23  ;;  %2624 = vmatpush1.bf16.msra.mxu1 %v4450_v53  ;;  %v4494_v23 = vld [vmem:[#allocation2 + $0x244] ss:$8 sps:$4 sm:$0xff]  }
 0x283   : > { %2062 = vmatprep.subr.bf16.mxu0 %v5567_v0  ;;  %2625 = vmatprep.subr.bf16.mxu1 %v4455_v54  ;;  %v4492_v0 = vld [vmem:[#allocation2 + $0x240] ss:$8 sps:$4 sm:$0xff]  }
 0x286   : > { %2063 = vmatpush1.bf16.msra.mxu0 %v5570_v24  ;;  %2626 = vmatpush1.bf16.msra.mxu1 %v4453_v56  ;;  %v4497_v24 = vld [vmem:[#allocation2 + $0x254] ss:$8 sps:$4 sm:$0xff]  }
 0x287   : > { %2194 = vmatprep.subr.bf16.mxu0 %v5573_v25  ;;  %2654 = vmatprep.subr.bf16.mxu1 %v4458_v58  ;;  %v4495_v25 = vld [vmem:[#allocation2 + $0x250] ss:$8 sps:$4 sm:$0xff]  }
 0x289   : > { %2081 = vmatmul.mubr.bf16.vlgmr.msra.gmra.mrb[8].mxu0 %v5554_v10  ;;  %2644 = vmatmul.mubr.bf16.vlgmr.msra.gmra.mrb[8].mxu1 %v5590_v61  ;;  %v4509_v10 = vld [vmem:[#allocation4 + $0x50] sm:$0xff]  }
 0x28a   : > { %2195 = vmatpush1.bf16.msra.mxu0 %v4432_v40  ;;  %2655 = vmatpush1.bf16.msra.mxu1 %v4456_v60  ;;  %v4513_v40 = vld [vmem:[#allocation4 + $0x60] sm:$0xff]  }
 0x28b   : > { %2196 = vmatprep.subr.bf16.mxu0 %v4437_v42  ;;  %2656 = vmatprep.subr.bf16.mxu1 %v4461_v62  ;;  %v4515_v42 = vld [vmem:[#allocation4 + $0x68] sm:$0xff]  }
 0x28c   : > { %2226 = vmatprep.mubr.bf16.mxu0 %v5811_v4  ;;  %2686 = vmatprep.mubr.bf16.mxu1 %v5811_v4 }
 0x28e   : > { %2197 = vmatpush1.bf16.msra.mxu0 %v4435_v43  ;;  %2657 = vmatpush1.bf16.msra.mxu1 %v4459_v63  ;;  %v4516_v43 = vld [vmem:[#allocation4 + $0x30] sm:$0xff]  }
 0x28f   : > { %2198 = vmatprep.subr.bf16.mxu0 %v4440_v44  ;;  %2658 = vmatprep.subr.bf16.mxu1 %v4464_v1  ;;  %v4517_v44 = vld [vmem:[#allocation4 + $0x70] sm:$0xff]  }
 0x292   : > { %2199 = vmatpush1.bf16.msra.mxu0 %v4438_v45  ;;  %2659 = vmatpush1.bf16.msra.mxu1 %v4462_v3  ;;  %v4518_v45 = vld [vmem:[#allocation4 + $0x38] sm:$0xff]  }
 0x293   : > { %2200 = vmatprep.subr.bf16.mxu0 %v4443_v46  ;;  %2660 = vmatprep.subr.bf16.mxu1 %v4467_v5  ;;  %v4519_v46 = vld [vmem:[#allocation4 + $0x78] sm:$0xff]  }
 0x296   : > { %2201 = vmatpush1.bf16.msra.mxu0 %v4441_v47  ;;  %2661 = vmatpush1.bf16.msra.mxu1 %v4465_v6 }
 0x297   : > { %2202 = vmatprep.subr.bf16.mxu0 %v4446_v48  ;;  %2662 = vmatprep.subr.bf16.mxu1 %v4470_v9 }
 0x29a   : > { %2203 = vmatpush1.bf16.msra.mxu0 %v4444_v49  ;;  %2663 = vmatpush1.bf16.msra.mxu1 %v4468_v11 }
 0x29b   : > { %2204 = vmatprep.subr.bf16.mxu0 %v4449_v50  ;;  %2664 = vmatprep.subr.bf16.mxu1 %v4473_v12 }
 0x29e   : > { %2205 = vmatpush1.bf16.msra.mxu0 %v4447_v51  ;;  %2665 = vmatpush1.bf16.msra.mxu1 %v4471_v7 }
 0x29f   : > { %2206 = vmatprep.subr.bf16.mxu0 %v4452_v52  ;;  %2666 = vmatprep.subr.bf16.mxu1 %v4476_v18 }
 0x2a2   : > { %2207 = vmatpush1.bf16.msra.mxu0 %v4450_v53  ;;  %2667 = vmatpush1.bf16.msra.mxu1 %v4474_v20 }
 0x2a3   : > { %2208 = vmatprep.subr.bf16.mxu0 %v4455_v54  ;;  %2668 = vmatprep.subr.bf16.mxu1 %v4479_v8 }
 0x2a6   : > { %2209 = vmatpush1.bf16.msra.mxu0 %v4453_v56  ;;  %2669 = vmatpush1.bf16.msra.mxu1 %v4477_v36  ;;  %v2758_v56 = vlaneseq }
 0x2a7   : > { %2342 = vmatprep.subr.bf16.mxu0 %v4458_v58  ;;  %2700 = vmatprep.subr.bf16.mxu1 %v4482_v13 }
 0x2a9   : > { %2227 = vmatmul.mubr.bf16.vlgmr.msra.gmra.mrb[8].mxu0 %v5558_v2  ;;  %2687 = vmatmul.mubr.bf16.vlgmr.msra.gmra.mrb[8].mxu1 %v2403_v15  ;;  %v4489_v2 = vld [vmem:[#allocation2 + $0x230] ss:$8 sps:$4 sm:$0xff]  }
 0x2aa   : > { %2343 = vmatpush1.bf16.msra.mxu0 %v4456_v60  ;;  %2701 = vmatpush1.bf16.msra.mxu1 %v4480_v14 }
 0x2ab   : > { %2344 = vmatprep.subr.bf16.mxu0 %v4461_v62  ;;  %2702 = vmatprep.subr.bf16.mxu1 %v4485_v16 }
 0x2ac   : > { %2374 = vmatprep.mubr.bf16.mxu0 %v5811_v4  ;;  %2732 = vmatprep.mubr.bf16.mxu1 %v5811_v4 }
 0x2ae   : > { %2345 = vmatpush1.bf16.msra.mxu0 %v4459_v63  ;;  %2703 = vmatpush1.bf16.msra.mxu1 %v4483_v17 }
 0x2af   : > { %2346 = vmatprep.subr.bf16.mxu0 %v4464_v1  ;;  %2704 = vmatprep.subr.bf16.mxu1 %v4488_v19 }
 0x2b2   : > { %2347 = vmatpush1.bf16.msra.mxu0 %v4462_v3  ;;  %2705 = vmatpush1.bf16.msra.mxu1 %v4486_v21 }
 0x2b3   : > { %2348 = vmatprep.subr.bf16.mxu0 %v4467_v5  ;;  %2706 = vmatprep.subr.bf16.mxu1 %v4491_v22 }
 0x2b6   : > { %2349 = vmatpush1.bf16.msra.mxu0 %v4465_v6  ;;  %2707 = vmatpush1.bf16.msra.mxu1 %v4489_v2 }
 0x2b7   : > { %2350 = vmatprep.subr.bf16.mxu0 %v4470_v9  ;;  %2708 = vmatprep.subr.bf16.mxu1 %v4494_v23  ;;  %v4520_v9 = vld [vmem:[#allocation4 + $0xc0] sm:$0xff]  }
 0x2ba   : > { %2351 = vmatpush1.bf16.msra.mxu0 %v4468_v11  ;;  %2709 = vmatpush1.bf16.msra.mxu1 %v4492_v0 }
 0x2bb   : > { %2352 = vmatprep.subr.bf16.mxu0 %v4473_v12  ;;  %2710 = vmatprep.subr.bf16.mxu1 %v4497_v24 }
 0x2be   : > { %2353 = vmatpush1.bf16.msra.mxu0 %v4471_v7  ;;  %2711 = vmatpush1.bf16.msra.mxu1 %v4495_v25 }
 0x2bf   : > { %2354 = vmatprep.subr.bf16.mxu0 %v4476_v18  ;;  %2712 = vmatprep.subr.bf16.mxu1 %v4500_v26  ;;  %v4521_v18 = vld [vmem:[#allocation4 + $0x80] sm:$0xff]  }
 0x2c2   : > { %2355 = vmatpush1.bf16.msra.mxu0 %v4474_v20  ;;  %2713 = vmatpush1.bf16.msra.mxu1 %v4498_v27 }
 0x2c3   : > { %2356 = vmatprep.subr.bf16.mxu0 %v4479_v8  ;;  %2714 = vmatprep.subr.bf16.mxu1 %v4503_v28  ;;  %v4522_v8 = vld [vmem:[#allocation4 + $0xc8] sm:$0xff]  }
 0x2c6   : > { %2357 = vmatpush1.bf16.msra.mxu0 %v4477_v36  ;;  %2715 = vmatpush1.bf16.msra.mxu1 %v4501_v29  ;;  %v4523_v36 = vld [vmem:[#allocation4 + $0x88] sm:$0xff]  }
 0x2c7   : > { %2485 = vmatprep.subr.bf16.mxu0 %v4482_v13  ;;  %v4524_v13 = vld [vmem:[#allocation4 + $0xd0] sm:$0xff]  }
 0x2c9   : > { %2375 = vmatmul.mubr.bf16.vlgmr.msra.gmra.mrb[8].mxu0 %v5590_v61  ;;  %2733 = vmatmul.mubr.bf16.vlgmr.msra.gmra.mrb[8].mxu1 %v2698_v30  ;;  %v5632_v61 = vshrl.u32 %v2758_v56, 7  ;;  %v4538_v30 = vld [vmem:[#allocation4 + $0x110] sm:$0xff]  }
 0x2ca   : > { %2486 = vmatpush1.bf16.msra.mxu0 %v4480_v14  ;;  %2517 = vmatprep.mubr.bf16.mxu0 %v5811_v4  ;;  %v4652_v4 = vmov 0.0   ;;  %v4525_v14 = vld [vmem:[#allocation4 + $0x90] sm:$0xff]  }
 0x2cb   : > { %2487 = vmatprep.subr.bf16.mxu0 %v4485_v16  ;;  %4008 = vmatprep.subr.bf16.mxu1 %v4652_v4  ;;  %v2760_v1 = vsub.s32 0, %v5632_v61  ;;  %v3200_v3 = vsub.s32 2, %v5632_v61  ;;  %v4527_v16 = vld [vmem:[#allocation4 + $0x98] sm:$0xff]  }
 0x2cc   : > { %4009 = vmatpush3.bf16.msra.mxu1 %v4504_v31  ;;  %4024 = vmatprep.mubr.msk.bf16.mxu1 %vm4653_vm0, %v4652_v4  ;;  %v4539_v31 = vld [vmem:[#allocation4 + $0x118] sm:$0xff]  }
 0x2cd   : > { %4010 = vmatprep.subr.bf16.mxu1 %v4652_v4 }
 0x2ce   : > { %2488 = vmatpush1.bf16.msra.mxu0 %v4483_v17  ;;  %v4528_v17 = vld [vmem:[#allocation4 + $0xe0] sm:$0xff]  }
 0x2cf   : > { %2489 = vmatprep.subr.bf16.mxu0 %v4488_v19  ;;  %v4529_v19 = vld [vmem:[#allocation4 + $0xa0] sm:$0xff]  }
 0x2d0   : > { %4011 = vmatpush3.bf16.msra.mxu1 %v4506_v33  ;;  %v4541_v33 = vld [vmem:[#allocation4 + $0x128] sm:$0xff]  }
 0x2d1   : > { %4012 = vmatprep.subr.bf16.mxu1 %v4652_v4 }
 0x2d2   : > { %2490 = vmatpush1.bf16.msra.mxu0 %v4486_v21  ;;  %v4530_v21 = vld [vmem:[#allocation4 + $0xe8] sm:$0xff]  }
 0x2d3   : > { %2491 = vmatprep.subr.bf16.mxu0 %v4491_v22  ;;  %v4531_v22 = vld [vmem:[#allocation4 + $0xa8] sm:$0xff]  }
 0x2d4   : > { %4013 = vmatpush3.bf16.msra.mxu1 %v4508_v35  ;;  %v4543_v35 = vld [vmem:[#allocation4 + $0x138] sm:$0xff]  }
 0x2d5   : > { %4014 = vmatprep.subr.bf16.mxu1 %v4652_v4 }
 0x2d6   : > { %2492 = vmatpush1.bf16.msra.mxu0 %v4489_v2  ;;  %v4532_v2 = vld [vmem:[#allocation4 + $0xf0] sm:$0xff]  }
 0x2d7   : > { %2493 = vmatprep.subr.bf16.mxu0 %v4494_v23  ;;  %v4533_v23 = vld [vmem:[#allocation4 + $0xb0] sm:$0xff]  }
 0x2d8   : > { %4015 = vmatpush3.bf16.msra.mxu1 %v4510_v37  ;;  %v4545_v37 = vld [vmem:[%s5759_s7 + $0x8] sm:$0xff]  }
 0x2d9   : > { %4016 = vmatprep.subr.bf16.mxu1 %v4652_v4 }
 0x2da   : > { %2494 = vmatpush1.bf16.msra.mxu0 %v4492_v0  ;;  %v4534_v0 = vld [vmem:[#allocation4 + $0xf8] sm:$0xff]  }
 0x2db   : > { %2495 = vmatprep.subr.bf16.mxu0 %v4497_v24  ;;  %v4535_v24 = vld [vmem:[#allocation4 + $0xb8] sm:$0xff]  }
 0x2dc   : > { %4017 = vmatpush3.bf16.msra.mxu1 %v4512_v39  ;;  %v4547_v39 = vld [vmem:[%s5759_s7 + $0x18] sm:$0xff]  }
 0x2dd   : > { %4018 = vmatprep.subr.bf16.mxu1 %v4652_v4 }
 0x2de   : > { %2496 = vmatpush1.bf16.msra.mxu0 %v4495_v25  ;;  %v2980_v25 = vsub.s32 1, %v5632_v61 }
 0x2df   : > { %2497 = vmatprep.subr.bf16.mxu0 %v4500_v26 }
 0x2e0   : > { %4019 = vmatpush3.bf16.msra.mxu1 %v4514_v41  ;;  %v4549_v41 = vld [vmem:[%s5759_s7 + $0x28] sm:$0xff]  }
 0x2e1   : > { %4020 = vmatprep.subr.bf16.mxu1 %v4652_v4 }
 0x2e2   : > { %2498 = vmatpush1.bf16.msra.mxu0 %v4498_v27  ;;  %v4536_v27 = vld [vmem:[#allocation4 + $0x100] sm:$0xff]  }
 0x2e3   : > { %2499 = vmatprep.subr.bf16.mxu0 %v4503_v28 }
 0x2e4   : > { %4021 = vmatpush3.bf16.msra.mxu1 %v4516_v43  ;;  %v4551_v43 = vld [vmem:[%s5759_s7 + $0x38] sm:$0xff]  }
 0x2e5   : > { %4022 = vmatprep.subr.bf16.mxu1 %v4652_v4 }
 0x2e6   : > { %2500 = vmatpush1.bf16.msra.mxu0 %v4501_v29  ;;  %v4537_v29 = vld [vmem:[#allocation4 + $0x108] sm:$0xff]  }
 0x2e7   : > { %3988 = vmatprep.subr.bf16.mxu0 %v4652_v4 }
 0x2e8   : > { %4023 = vmatpush3.bf16.msra.mxu1 %v4518_v45  ;;  %v4553_v45 = vld [vmem:[%s5761_s9 + $0x8] sm:$0xff]  }
 0x2e9   : > { %2518 = vmatmul.mubr.bf16.vlgmr.msra.gmra.mrb[8].mxu0 %v2403_v15  ;;  %4048 = vmatprep.subr.bf16.mxu1 %v4652_v4  ;;  %v4526_v15 = vld [vmem:[#allocation4 + $0xd8] sm:$0xff]  }
 0x2ea   : > { %3989 = vmatpush3.bf16.msra.mxu0 %v4505_v32  ;;  %4004 = vmatprep.mubr.msk.bf16.mxu0 %vm4653_vm0, %v4652_v4  ;;  %v4540_v32 = vld [vmem:[#allocation4 + $0x120] sm:$0xff]  }
 0x2eb   : > { %3990 = vmatprep.subr.bf16.mxu0 %v4652_v4 }
 0x2ee   : > { %3991 = vmatpush3.bf16.msra.mxu0 %v4507_v34  ;;  %v4542_v34 = vld [vmem:[#allocation4 + $0x130] sm:$0xff]  }
 0x2ef   : > { %3992 = vmatprep.subr.bf16.mxu0 %v4652_v4 }
 0x2f2   : > { %3993 = vmatpush3.bf16.msra.mxu0 %v4509_v10  ;;  %v4544_v10 = vld [vmem:[%s5759_s7] sm:$0xff]  }
 0x2f3   : > { %3994 = vmatprep.subr.bf16.mxu0 %v4652_v4 }
 0x2f6   : > { %3995 = vmatpush3.bf16.msra.mxu0 %v4511_v38  ;;  %v4546_v38 = vld [vmem:[%s5759_s7 + $0x10] sm:$0xff]  }
 0x2f7   : > { %3996 = vmatprep.subr.bf16.mxu0 %v4652_v4 }
 0x2fa   : > { %3997 = vmatpush3.bf16.msra.mxu0 %v4513_v40  ;;  %v4548_v40 = vld [vmem:[%s5759_s7 + $0x20] sm:$0xff]  }
 0x2fb   : > { %3998 = vmatprep.subr.bf16.mxu0 %v4652_v4 }
 0x2fe   : > { %3999 = vmatpush3.bf16.msra.mxu0 %v4515_v42  ;;  %v4550_v42 = vld [vmem:[%s5759_s7 + $0x30] sm:$0xff]  }
 0x2ff   : > { %4000 = vmatprep.subr.bf16.mxu0 %v4652_v4 }
 0x302   : > { %4001 = vmatpush3.bf16.msra.mxu0 %v4517_v44  ;;  %v4552_v44 = vld [vmem:[%s5761_s9] sm:$0xff]  }
 0x303   : > { %4002 = vmatprep.subr.bf16.mxu0 %v4652_v4 }
 0x306   : > { %4003 = vmatpush3.bf16.msra.mxu0 %v4519_v46  ;;  %v4554_v46 = vld [vmem:[%s5761_s9 + $0x10] sm:$0xff]  }
 0x307   : > { %4028 = vmatprep.subr.bf16.mxu0 %v4652_v4 }
 0x39c   : > { %v2734_v47 = vpop.f32.mrb[8].mxu1 }
 0x39d   : > { %v2736_v48 = vpop.f32.mrb[9].mxu1 }
 0x39e   : > { %v2743_v49 = vmax.f32 %v2734_v47, %v2736_v48  ;;  %v2738_v50 = vpop.f32.mrb[10].mxu1  ;;  %v4555_v47 = vld [vmem:[%s5761_s9 + $0x18] sm:$0xff]   ;;  %v4556_v48 = vld [vmem:[%s5761_s9 + $0x20] sm:$0xff]  }
 0x39f   : > { %v2739_v51 = vpop.f32.mrb[11].mxu1 }
 0x3bc   : > { %v2519_v52 = vpop.f32.mrb[8].mxu0 }
 0x3bd   : > { %v2521_v53 = vpop.f32.mrb[9].mxu0 }
 0x3be   : > { %v2528_v54 = vmax.f32 %v2519_v52, %v2521_v53  ;;  %v2523_v55 = vpop.f32.mrb[10].mxu0 }
 0x3bf   : > { %v2524_v58 = vpop.f32.mrb[11].mxu0 }
 0x3c0   : > { %v2744_v59 = vmax.f32 %v2528_v54, %v2743_v49  ;;  %v4557_v49 = vld [vmem:[%s5761_s9 + $0x28] sm:$0xff]  }
 0x3c2   : > { %v2752_v60 = vadd.f32 %v3862_v57, %v2744_v59 }
 0x3c4   : > { %v2753_v62 = vmax.f32 %v2752_v60, 0.0 }
 0x3c6   : > { %v2754_v63 = vpack.c.bf16 %v2753_v62, %v2753_v62 }
 0x3c8   : > { %v2756_v5 = vpack.i.b16 %v2754_v63, %v2754_v63  ;;  %v2778_v6 = vshrl.u32 %v2754_v63, 16 }
 0x3ca   : > { %v2779_v11 = vpack.i.b16 %v2778_v6, %v2778_v6  ;;  %v2761_v12 = vrot.slane %v2756_v5, %v2760_v1  ;;  %v5636_v7 = vrot.slane %v2756_v5, %v3200_v3  ;;  %v2981_v28 = vrot.slane %v2756_v5, %v2980_v25 }
 0x3cc   : > { %4025 = vmatmul.mubr.bf16.vlgmr.msra.gmra.mrb[12].mxu1 %v2761_v12  ;;  %v2784_v20 = vrot.slane %v2779_v11, %v2760_v1  ;;  %v3091_v26 = vrot.slane %v2779_v11, %v2980_v25  ;;  %v3903_v12 = vld [vmem:[%s5758_s6] ss:$0 sm:$0xff] }
 0x3cd   : > { %4049 = vmatpush3.bf16.msra.mxu1 %v4520_v9  ;;  %4064 = vmatprep.mubr.msk.bf16.mxu1 %vm4653_vm0, %v4652_v4 }
 0x3ce   : > { %4005 = vmatmul.mubr.bf16.vlgmr.msra.gmra.mrb[12].mxu0 %v2784_v20  ;;  %4050 = vmatprep.subr.bf16.mxu1 %v4652_v4 }
 0x3cf   : > { %4029 = vmatpush3.bf16.msra.mxu0 %v4521_v18  ;;  %4044 = vmatprep.mubr.msk.bf16.mxu0 %vm4653_vm0, %v4652_v4 }
 0x3d0   : > { %4030 = vmatprep.subr.bf16.mxu0 %v4652_v4 }
 0x3d1   : > { %4051 = vmatpush3.bf16.msra.mxu1 %v4522_v8 }
 0x3d2   : > { %4052 = vmatprep.subr.bf16.mxu1 %v4652_v4 }
 0x3d3   : > { %4031 = vmatpush3.bf16.msra.mxu0 %v4523_v36 }
 0x3d4   : > { %4032 = vmatprep.subr.bf16.mxu0 %v4652_v4 }
 0x3d5   : > { %4053 = vmatpush3.bf16.msra.mxu1 %v4524_v13 }
 0x3d6   : > { %4054 = vmatprep.subr.bf16.mxu1 %v4652_v4 }
 0x3d7   : > { %4033 = vmatpush3.bf16.msra.mxu0 %v4525_v14 }
 0x3d8   : > { %4034 = vmatprep.subr.bf16.mxu0 %v4652_v4 }
 0x3d9   : > { %4055 = vmatpush3.bf16.msra.mxu1 %v4526_v15  ;;  %v4558_v15 = vld [vmem:[%s5761_s9 + $0x30] sm:$0xff]  }
 0x3da   : > { %4056 = vmatprep.subr.bf16.mxu1 %v4652_v4 }
 0x3db   : > { %4035 = vmatpush3.bf16.msra.mxu0 %v4527_v16  ;;  %v4559_v16 = vld [vmem:[%s5761_s9 + $0x38] sm:$0xff]  }
 0x3dc   : > { %4036 = vmatprep.subr.bf16.mxu0 %v4652_v4 }
 0x3dd   : > { %4057 = vmatpush3.bf16.msra.mxu1 %v4528_v17  ;;  %v3904_v17 = vld [vmem:[%s5760_s8] ss:$0 sm:$0xff] }
 0x3de   : > { %4058 = vmatprep.subr.bf16.mxu1 %v4652_v4 }
 0x3df   : > { %4037 = vmatpush3.bf16.msra.mxu0 %v4529_v19 }
 0x3e0   : > { %4038 = vmatprep.subr.bf16.mxu0 %v4652_v4 }
 0x3e1   : > { %4059 = vmatpush3.bf16.msra.mxu1 %v4530_v21 }
 0x3e2   : > { %4060 = vmatprep.subr.bf16.mxu1 %v4652_v4 }
 0x3e3   : > { %4039 = vmatpush3.bf16.msra.mxu0 %v4531_v22 }
 0x3e4   : > { %4040 = vmatprep.subr.bf16.mxu0 %v4652_v4 }
 0x3e5   : > { %4061 = vmatpush3.bf16.msra.mxu1 %v4532_v2 }
 0x3e6   : > { %4062 = vmatprep.subr.bf16.mxu1 %v4652_v4 }
 0x3e7   : > { %4041 = vmatpush3.bf16.msra.mxu0 %v4533_v23 }
 0x3e8   : > { %4042 = vmatprep.subr.bf16.mxu0 %v4652_v4 }
 0x3e9   : > { %4063 = vmatpush3.bf16.msra.mxu1 %v4534_v0 }
 0x3ea   : > { %4088 = vmatprep.subr.bf16.mxu1 %v4652_v4 }
 0x3eb   : > { %4043 = vmatpush3.bf16.msra.mxu0 %v4535_v24 }
 0x3ec   : > { %4065 = vmatmul.mubr.bf16.vlgmr.msra.gmra.mrb[16].mxu1 %v3091_v26  ;;  %4068 = vmatprep.subr.bf16.mxu0 %v4652_v4 }
 0x3ed   : > { %4104 = vmatprep.mubr.msk.bf16.mxu1 %vm4653_vm0, %v4652_v4  ;;  %4089 = vmatpush3.bf16.msra.mxu1 %v4544_v10 }
 0x3ee   : > { %4045 = vmatmul.mubr.bf16.vlgmr.msra.gmra.mrb[16].mxu0 %v2981_v28  ;;  %4090 = vmatprep.subr.bf16.mxu1 %v4652_v4 }
 0x3ef   : > { %4069 = vmatpush3.bf16.msra.mxu0 %v4536_v27  ;;  %4084 = vmatprep.mubr.msk.bf16.mxu0 %vm4653_vm0, %v4652_v4 }
 0x3f0   : > { %4070 = vmatprep.subr.bf16.mxu0 %v4652_v4 }
 0x3f1   : > { %4091 = vmatpush3.bf16.msra.mxu1 %v4545_v37 }
 0x3f2   : > { %4092 = vmatprep.subr.bf16.mxu1 %v4652_v4 }
 0x3f3   : > { %4071 = vmatpush3.bf16.msra.mxu0 %v4537_v29 }
 0x3f4   : > { %4072 = vmatprep.subr.bf16.mxu0 %v4652_v4 }
 0x3f5   : > { %4093 = vmatpush3.bf16.msra.mxu1 %v4546_v38 }
 0x3f6   : > { %4094 = vmatprep.subr.bf16.mxu1 %v4652_v4 }
 0x3f7   : > { %4073 = vmatpush3.bf16.msra.mxu0 %v4538_v30 }
 0x3f8   : > { %4074 = vmatprep.subr.bf16.mxu0 %v4652_v4 }
 0x3f9   : > { %4095 = vmatpush3.bf16.msra.mxu1 %v4547_v39 }
 0x3fa   : > { %4096 = vmatprep.subr.bf16.mxu1 %v4652_v4 }
 0x3fb   : > { %4075 = vmatpush3.bf16.msra.mxu0 %v4539_v31 }
 0x3fc   : > { %4076 = vmatprep.subr.bf16.mxu0 %v4652_v4 }
 0x3fd   : > { %4097 = vmatpush3.bf16.msra.mxu1 %v4548_v40 }
 0x3fe   : > { %4098 = vmatprep.subr.bf16.mxu1 %v4652_v4 }
 0x3ff   : > { %4077 = vmatpush3.bf16.msra.mxu0 %v4540_v32 }
 0x400   : > { %4078 = vmatprep.subr.bf16.mxu0 %v4652_v4 }
 0x401   : > { %4099 = vmatpush3.bf16.msra.mxu1 %v4549_v41 }
 0x402   : > { %4100 = vmatprep.subr.bf16.mxu1 %v4652_v4 }
 0x403   : > { %4079 = vmatpush3.bf16.msra.mxu0 %v4541_v33 }
 0x404   : > { %4080 = vmatprep.subr.bf16.mxu0 %v4652_v4 }
 0x405   : > { %4101 = vmatpush3.bf16.msra.mxu1 %v4550_v42 }
 0x406   : > { %4102 = vmatprep.subr.bf16.mxu1 %v4652_v4 }
 0x407   : > { %4081 = vmatpush3.bf16.msra.mxu0 %v4542_v34 }
 0x408   : > { %4082 = vmatprep.subr.bf16.mxu0 %v4652_v4 }
 0x409   : > { %4103 = vmatpush3.bf16.msra.mxu1 %v4551_v43 }
 0x40b   : > { %4083 = vmatpush3.bf16.msra.mxu0 %v4543_v35 }
 0x40c   : > { %4108 = vmatprep.subr.bf16.mxu0 %v4652_v4 }
 0x40e   : > { %4085 = vmatmul.mubr.bf16.vlgmr.msra.gmra.mrb[20].mxu0 %v5636_v7 }
 0x40f   : > { %4124 = vmatprep.mubr.msk.bf16.mxu0 %vm4653_vm0, %v4652_v4  ;;  %4109 = vmatpush3.bf16.msra.mxu0 %v4552_v44 }
 0x410   : > { %4110 = vmatprep.subr.bf16.mxu0 %v4652_v4 }
 0x413   : > { %4111 = vmatpush3.bf16.msra.mxu0 %v4553_v45 }
 0x414   : > { %4112 = vmatprep.subr.bf16.mxu0 %v4652_v4 }
 0x417   : > { %4113 = vmatpush3.bf16.msra.mxu0 %v4554_v46 }
 0x418   : > { %4114 = vmatprep.subr.bf16.mxu0 %v4652_v4 }
 0x41b   : > { %4115 = vmatpush3.bf16.msra.mxu0 %v4555_v47 }
 0x41c   : > { %4116 = vmatprep.subr.bf16.mxu0 %v4652_v4 }
 0x41f   : > { %4117 = vmatpush3.bf16.msra.mxu0 %v4556_v48 }
 0x420   : > { %4118 = vmatprep.subr.bf16.mxu0 %v4652_v4 }
 0x423   : > { %4119 = vmatpush3.bf16.msra.mxu0 %v4557_v49 }
 0x424   : > { %4120 = vmatprep.subr.bf16.mxu0 %v4652_v4 }
 0x427   : > { %4121 = vmatpush3.bf16.msra.mxu0 %v4558_v15 }
 0x428   : > { %4122 = vmatprep.subr.bf16.mxu0 %v4652_v4  ;;  %v3913_v4 = vld [vmem:[%s5762_s10] ss:$0 sm:$0xff] }
 0x42b   : > { %4123 = vmatpush3.bf16.msra.mxu0 %v4559_v16 }
 0x49f   : > { %v2972_v50 = vpop.f32.mrb[12].mxu1 }
 0x4a0   : > { %v4026_v51 = vpop.f32.mrb[13].mxu1 }
 0x4a1   : > { %v2884_v52 = vpop.f32.mrb[12].mxu0  ;;  %v2975_v53 = vpop.f32.mrb[14].mxu1 }
 0x4a2   : > { %v2973_v54 = vadd.f32 %v2972_v50, %v2884_v52  ;;  %v4006_v55 = vpop.f32.mrb[13].mxu0  ;;  %v4027_v56 = vpop.f32.mrb[15].mxu1 }
 0x4a3   : > { %v2887_v57 = vpop.f32.mrb[14].mxu0 }
 0x4a4   : > { %v4007_v58 = vpop.f32.mrb[15].mxu0 }
 0x4bf   : > { %v3191_v59 = vpop.f32.mrb[16].mxu1 }
 0x4c0   : > { %v4066_v60 = vpop.f32.mrb[17].mxu1 }
 0x4c1   : > { %v3081_v61 = vpop.f32.mrb[16].mxu0  ;;  %v3194_v62 = vpop.f32.mrb[18].mxu1 }
 0x4c2   : > { %v3087_v63 = vadd.f32 %v3081_v61, %v2973_v54  ;;  %v4046_v1 = vpop.f32.mrb[17].mxu0  ;;  %v4067_v3 = vpop.f32.mrb[19].mxu1 }
 0x4c3   : > { %v3084_v5 = vpop.f32.mrb[18].mxu0 }
 0x4c4   : > { %v4047_v6 = vpop.f32.mrb[19].mxu0  ;;  %v3197_v9 = vadd.f32 %v3191_v59, %v3087_v63 }
 0x4e1   : > { %v3301_v11 = vpop.f32.mrb[20].mxu0 }
 0x4e2   : > { %v3307_v7 = vadd.f32 %v3301_v11, %v3197_v9  ;;  %v4086_v18 = vpop.f32.mrb[21].mxu0 }
 0x4e3   : > { %v3304_v20 = vpop.f32.mrb[22].mxu0 }
 0x4e4   : > { %v3315_v8 = vadd.f32 %v3903_v12, %v3307_v7  ;;  %v4087_v36 = vpop.f32.mrb[23].mxu0 }
 0x4e6   : > { %v3316_v13 = vmax.f32 %v3315_v8, 0.0 }
 0x4e8   : > { %v3317_v14 = vpack.c.bf16 %v3316_v13, %v3316_v13 }
 0x4ea   : > { %4105 = vmatmul.mubr.bf16.vlgmr.msra.gmra.mrb[20].mxu1 %v3317_v14 }
 0x5bd   : > { %v3423_v19 = vpop.f32.mrb[20].mxu1 }
 0x5be   : > { %v3424_v21 = vadd.f32 %v3904_v17, %v3423_v19  ;;  %v4106_v22 = vpop.f32.mrb[21].mxu1 }
 0x5bf   : > { %v3426_v2 = vpop.f32.mrb[22].mxu1 }
 0x5c0   : > { %v3429_v23 = vmax.f32 %v3424_v21, 0.0  ;;  %v4107_v0 = vpop.f32.mrb[23].mxu1 }
 0x5c2   : > { %v3430_v24 = vpack.c.bf16 %v3429_v23, %v3429_v23 }
 0x5c4   : > { %4125 = vmatmul.mubr.bf16.vlgmr.msra.gmra.mrb[24].mxu0 %v3430_v24 }
 0x697   : > { %v3536_v25 = vpop.f32.mrb[24].mxu0 }
 0x698   : > { %v3537_v26 = vadd.f32 %v3913_v4, %v3536_v25  ;;  %v4126_v27 = vpop.f32.mrb[25].mxu0 }
 0x699   : > { %v3539_v28 = vpop.f32.mrb[26].mxu0 }
 0x69a   : > { %3542 = vst [vmem:[%s414_s18] sm:$0xff] %v3537_v26  ;;  %v4127_v29 = vpop.f32.mrb[27].mxu0 }
 0x69b PF: > { %s23_s17 = sadd.s32 1, %s4643_s17  }
 0x69c   : > { %p20_p9 = scmp.ge.s32.totalorder %s23_s17, 4  }
 0x69e   :  { %22 = sbr.rel (!%p20_p9) target bundleno = 2 (0x2), region = 118 }
 0x6a5   :  { %3562 = vsyncpa [#allocation3], 1 }
 0x6a6   :  { %3564 = vsyncpa [#allocation3 + $0x1], 1 }
 0x6a7   :  { %3565 = vsyncpa [#allocation5], 1 }

</bundles_post_ra>
